<compile_context>
chip_gen: v6e
topology: v6e:2x2x1
jax: 0.10.0
libtpu: 0.0.40
codegen_flags: <defaults>
</compile_context>

<pallas_src>
import functools
import math

import jax
import jax.numpy as jnp
from jax.experimental import pallas as pl
from jax.experimental.pallas import tpu as pltpu

INPUT_DIM = 561
D_MODEL = 128
NHEAD = 4
NUM_LAYERS = 3
DIM_FF = 256
NUM_CLASSES = 6
LN_EPS = 1e-5


def _layernorm(z, g, b, eps=LN_EPS):
    m = jnp.mean(z, axis=-1, keepdims=True)
    c = z - m
    v = jnp.mean(c * c, axis=-1, keepdims=True)      # biased var, like torch LayerNorm
    return c * jax.lax.rsqrt(v + eps) * g + b


def _zero_index(i, n):
    return (0,) * n


def _har_kernel(
    x_ref, pe_ref,
    emb_w_ref, emb_b_ref,
    wqkv_ref, bqkv_ref, wo_ref, bo_ref,
    ln1g_ref, ln1b_ref,
    w1_ref, b1_ref, w2_ref, b2_ref,
    ln2g_ref, ln2b_ref,
    wc1_ref, bc1_ref, wc2_ref, bc2_ref,
    out_ref,
    *, tb, seq, nhead, num_layers,
):
    bf16 = jnp.bfloat16
    d_model = wo_ref.shape[-1]
    head_dim = d_model // nhead
    scale = 1.0 / math.sqrt(head_dim)
    rows = tb * seq

    # ---- embedding + positional encoding (pe pre-tiled to (rows, D)) ----
    h = jnp.dot(x_ref[...], emb_w_ref[...],
                preferred_element_type=jnp.float32) + emb_b_ref[...]
    h = h + pe_ref[...]

    if seq > 1:
        # Hoisted trace-time constants for the stacked-head attention.
        # mask4[0, hh, 0, d] = 1 iff lane d belongs to head hh.
        lane_h = jax.lax.broadcasted_iota(jnp.int32, (1, nhead, 1, d_model), 3) // head_dim
        head_h = jax.lax.broadcasted_iota(jnp.int32, (1, nhead, 1, d_model), 1)
        mask4 = (lane_h == head_h).astype(jnp.float32)
        # ones_st[b, hh*seq + k, d] = 1 iff lane d belongs to head hh (for any k);
        # contracting p against it recovers the per-head softmax denominator
        # broadcast across that head's lanes (no lane-splitting reshape needed).
        key_h = jax.lax.broadcasted_iota(jnp.int32, (1, nhead * seq, d_model), 1) // seq
        lane_h2 = jax.lax.broadcasted_iota(jnp.int32, (1, nhead * seq, d_model), 2) // head_dim
        ones_st = jnp.broadcast_to((key_h == lane_h2).astype(jnp.float32),
                                   (tb, nhead * seq, d_model))

    # ---- transformer encoder layers (post-norm, dropout = identity) ----
    for l in range(num_layers):
        qkv = jnp.dot(h.astype(bf16), wqkv_ref[l],
                      preferred_element_type=jnp.float32) + bqkv_ref[l]
        if seq == 1:
            # Softmax over a single key is the identity -> attention output == V.
            attn = qkv[:, 2 * d_model:3 * d_model]
        else:
            q = qkv[:, 0:d_model].reshape(tb, seq, d_model)
            k = qkv[:, d_model:2 * d_model].reshape(tb, seq, d_model)
            v = qkv[:, 2 * d_model:3 * d_model].reshape(tb, seq, d_model)
            # Stack the per-head masked K / V along the key axis: (tb, H*S, D).
            k_st = (k[:, None, :, :] * mask4).reshape(tb, nhead * seq, d_model)
            v_st = (v[:, None, :, :] * mask4).reshape(tb, nhead * seq, d_model)
            # Exact per-head scores: off-head lanes of K are zeroed.
            sc = jnp.einsum("bqd,bkd->bqk", q, k_st,
                            preferred_element_type=jnp.float32) * scale
            # Per-(b, q) shift is constant within every head -> softmax-invariant.
            sc = sc - jnp.max(sc, axis=-1, keepdims=True)
            p = jnp.exp(sc)                                       # (tb, S, H*S)
            num = jnp.einsum("bqk,bkd->bqd", p, v_st,
                             preferred_element_type=jnp.float32)
            den = jnp.einsum("bqk,bkd->bqd", p, ones_st,
                             preferred_element_type=jnp.float32)
            attn = (num / jnp.maximum(den, 1e-30)).reshape(rows, d_model)
        attn = jnp.dot(attn.astype(bf16), wo_ref[l],
                       preferred_element_type=jnp.float32) + bo_ref[l]
        h = _layernorm(h + attn, ln1g_ref[l], ln1b_ref[l])

        ff = jnp.dot(h.astype(bf16), w1_ref[l],
                     preferred_element_type=jnp.float32) + b1_ref[l]
        ff = jnp.maximum(ff, 0.0)
        ff = jnp.dot(ff.astype(bf16), w2_ref[l],
                     preferred_element_type=jnp.float32) + b2_ref[l]
        h = _layernorm(h + ff, ln2g_ref[l], ln2b_ref[l])

    # ---- classifier (Linear -> ReLU -> [Dropout=id] -> Linear), lane-dense ----
    c = jnp.dot(h.astype(bf16), wc1_ref[...],
                preferred_element_type=jnp.float32) + bc1_ref[...]
    c = jnp.maximum(c, 0.0)
    logits = jnp.dot(c.astype(bf16), wc2_ref[...],
                     preferred_element_type=jnp.float32) + bc2_ref[...]
    out_ref[...] = logits.astype(out_ref.dtype)


def positional_encoding(seq, d_model):
    pos = jnp.arange(seq, dtype=jnp.float32)[:, None]
    div = jnp.exp(jnp.arange(0, d_model, 2, dtype=jnp.float32)
                  * (-math.log(10000.0) / d_model))
    pe = jnp.zeros((seq, d_model), jnp.float32)
    pe = pe.at[:, 0::2].set(jnp.sin(pos * div))
    pe = pe.at[:, 1::2].set(jnp.cos(pos * div))
    return pe


def init_params(key, din=INPUT_DIM, d=D_MODEL, ff=DIM_FF,
                layers=NUM_LAYERS, classes=NUM_CLASSES):
    keys = jax.random.split(key, 8)

    def w(k, shape, fan_in):
        return jax.random.normal(k, shape, jnp.float32) * (1.0 / math.sqrt(fan_in))

    return dict(
        emb_w=w(keys[0], (din, d), din),
        emb_b=jnp.zeros((1, d), jnp.float32),
        wqkv=w(keys[1], (layers, d, 3 * d), d),
        bqkv=jnp.zeros((layers, 1, 3 * d), jnp.float32),
        wo=w(keys[2], (layers, d, d), d),
        bo=jnp.zeros((layers, 1, d), jnp.float32),
        ln1g=jnp.ones((layers, 1, d), jnp.float32),
        ln1b=jnp.zeros((layers, 1, d), jnp.float32),
        w1=w(keys[3], (layers, d, ff), d),
        b1=jnp.zeros((layers, 1, ff), jnp.float32),
        w2=w(keys[4], (layers, ff, d), ff),
        b2=jnp.zeros((layers, 1, d), jnp.float32),
        ln2g=jnp.ones((layers, 1, d), jnp.float32),
        ln2b=jnp.zeros((layers, 1, d), jnp.float32),
        wc1=w(keys[5], (d, d // 2), d),
        bc1=jnp.zeros((1, d // 2), jnp.float32),
        wc2=w(keys[6], (d // 2, classes), d // 2),
        bc2=jnp.zeros((1, classes), jnp.float32),
    )


def _pad_axis(a, axis, to):
    pad = [(0, 0)] * a.ndim
    pad[axis] = (0, to - a.shape[axis])
    return jnp.pad(a, pad)


def _vmem_limit_bytes():
    """Chip-aware scoped-VMEM request: physical minus ~16 MiB headroom,
    clamped to [32, 100] MiB (v7x -> 48 MiB, v5e/v6e -> 100 MiB)."""
    mib = 1024 * 1024
    try:
        cap = int(pltpu.get_tpu_info().vmem_capacity_bytes)
    except Exception:
        return 48 * mib
    return int(min(max(cap - 16 * mib, 32 * mib), 100 * mib))


def _pick_batch_tile(B, S):
    # Aim for ~2048 rows per grid step (fills the 256x256 MXU and amortizes the
    # ~0.35us per-step overhead); shrink the target for long sequences so the
    # (rows, 4*S) score slab stays small; keep >= 2 grid steps when possible
    # (v7x has 2 TensorCores); keep the block's sublane count 16-aligned (bf16
    # tiling) unless the block spans the full array.
    target_rows = min(2048, max(256, (1 << 19) // max(S, 1)))
    ok = [t for t in range(1, B + 1)
          if B % t == 0 and ((t * S) % 16 == 0 or t == B)]
    pref = [t for t in ok if t * S <= target_rows and B // t >= 2]
    if pref:
        return max(pref)
    under = [t for t in ok if t * S <= target_rows]
    return max(under) if under else min(ok)


def har_transformer_forward(x, params, *, nhead=NHEAD, batch_tile=None):
    B, S, din = x.shape
    d = params["emb_w"].shape[1]
    layers = params["wqkv"].shape[0]
    classes = params["wc2"].shape[1]
    cls_hidden = params["wc1"].shape[1]
    bf16 = jnp.bfloat16

    # ---- lane-friendly zero padding; matmul weights cast once to bf16 ----
    din_pad = pl.cdiv(din, 128) * 128            # 561 -> 640
    hid_pad = pl.cdiv(cls_hidden, 128) * 128     # 64  -> 128
    out_pad = pl.cdiv(classes, 128) * 128        # 6   -> 128

    emb_w = _pad_axis(params["emb_w"], 0, din_pad).astype(bf16)
    wqkv = params["wqkv"].astype(bf16)
    wo = params["wo"].astype(bf16)
    w1 = params["w1"].astype(bf16)
    w2 = params["w2"].astype(bf16)
    wc1 = _pad_axis(params["wc1"], 1, hid_pad).astype(bf16)
    bc1 = _pad_axis(params["bc1"], 1, hid_pad)
    wc2 = _pad_axis(_pad_axis(params["wc2"], 0, hid_pad), 1, out_pad).astype(bf16)
    bc2 = _pad_axis(params["bc2"], 1, out_pad)

    # single fused pre-pass over x: bf16 cast + zero pad (no extra f32 copy)
    x2 = _pad_axis(x.reshape(B * S, din).astype(bf16), 1, din_pad)

    if batch_tile is None:
        batch_tile = _pick_batch_tile(B, S)
    assert B % batch_tile == 0
    rows = batch_tile * S
    assert rows % 16 == 0 or batch_tile == B, \
        "block rows must be 16-aligned or cover the full batch"
    grid = (B // batch_tile,)

    pe_tiled = jnp.tile(positional_encoding(S, d), (batch_tile, 1))   # (rows, D) f32

    weight_args = [emb_w, params["emb_b"],
                   wqkv, params["bqkv"], wo, params["bo"],
                   params["ln1g"], params["ln1b"],
                   w1, params["b1"], w2, params["b2"],
                   params["ln2g"], params["ln2b"],
                   wc1, bc1, wc2, bc2]
    # constant index maps -> weights fetched once, stay VMEM-resident
    weight_specs = [pl.BlockSpec(w.shape, functools.partial(_zero_index, n=w.ndim))
                    for w in weight_args]

    in_specs = ([pl.BlockSpec((rows, din_pad), lambda i: (i, 0)),
                 pl.BlockSpec(pe_tiled.shape, functools.partial(_zero_index, n=2))]
                + weight_specs)
    out_specs = pl.BlockSpec((rows, out_pad), lambda i: (i, 0))

    kernel = functools.partial(_har_kernel, tb=batch_tile, seq=S,
                               nhead=nhead, num_layers=layers)

    out = pl.pallas_call(
        kernel,
        out_shape=jax.ShapeDtypeStruct((B * S, out_pad), jnp.bfloat16),
        grid_spec=pltpu.PrefetchScalarGridSpec(
            num_scalar_prefetch=0, grid=grid,
            in_specs=in_specs, out_specs=out_specs),
        compiler_params=pltpu.CompilerParams(
            dimension_semantics=("parallel",),        # v7x: shard batch grid on both TCs
            vmem_limit_bytes=_vmem_limit_bytes()),
    )(x2, pe_tiled, *weight_args)

    out = out[:, :classes].astype(jnp.float32).reshape(B, S, classes)
    if S == 1:   # torch `x.squeeze(1)` only drops the dim when it is size 1
        out = out[:, 0, :]
    return out


def har_transformer_reference(x, params, *, nhead=NHEAD):
    """Pure-JAX f32 reference mirroring the PyTorch forward (eval mode)."""
    B, S, din = x.shape
    d = params["emb_w"].shape[1]
    hd = d // nhead
    h = x @ params["emb_w"] + params["emb_b"]                      # (B,S,D)
    h = h + positional_encoding(S, d)[None]
    for l in range(params["wqkv"].shape[0]):
        qkv = h @ params["wqkv"][l] + params["bqkv"][l]
        q, k, v = jnp.split(qkv, 3, axis=-1)
        q = q.reshape(B, S, nhead, hd).transpose(0, 2, 1, 3)
        k = k.reshape(B, S, nhead, hd).transpose(0, 2, 1, 3)
        v = v.reshape(B, S, nhead, hd).transpose(0, 2, 1, 3)
        sc = jnp.einsum("bhqd,bhkd->bhqk", q, k) / math.sqrt(hd)
        p = jax.nn.softmax(sc, axis=-1)
        a = jnp.einsum("bhqk,bhkd->bhqd", p, v).transpose(0, 2, 1, 3).reshape(B, S, d)
        a = a @ params["wo"][l] + params["bo"][l]
        h = _layernorm(h + a, params["ln1g"][l], params["ln1b"][l])
        ff = jnp.maximum(h @ params["w1"][l] + params["b1"][l], 0.0)
        ff = ff @ params["w2"][l] + params["b2"][l]
        h = _layernorm(h + ff, params["ln2g"][l], params["ln2b"][l])
    if S == 1:
        h = h[:, 0, :]
    c = jnp.maximum(h @ params["wc1"] + params["bc1"], 0.0)
    return c @ params["wc2"] + params["bc2"]


if __name__ == "__main__":
    key = jax.random.PRNGKey(0)
    kp, kx = jax.random.split(key)
    params = init_params(kp)

    # Canonical HAR shape (B, 1, 561): exercises the S==1 specialised path.
    B1 = 4
    x1 = jax.random.normal(kx, (B1, 1, INPUT_DIM), jnp.float32)
    out1 = har_transformer_forward(x1, params)
    jax.block_until_ready(out1)
    assert out1.shape == (B1, NUM_CLASSES), out1.shape
    ref1 = har_transformer_reference(x1, params)
    err1 = float(jnp.max(jnp.abs(out1 - ref1)))
    assert err1 < 1e-1, f"S=1 path: max abs diff vs reference too large: {err1}"

    # S > 1: exercises the stacked-head attention and the batch grid (grid=(2,)).
    B2, S2 = 4, 8
    x2 = jax.random.normal(jax.random.PRNGKey(1), (B2, S2, INPUT_DIM), jnp.float32)
    out2 = har_transformer_forward(x2, params, batch_tile=2)
    jax.block_until_ready(out2)
    assert out2.shape == (B2, S2, NUM_CLASSES), out2.shape
    ref2 = har_transformer_reference(x2, params)
    err2 = float(jnp.max(jnp.abs(out2 - ref2)))
    assert err2 < 1e-1, f"S>1 path: max abs diff vs reference too large: {err2}"

    print("KERNEL_OK")
</pallas_src>

<mosaic_0001>
module attributes {stable_mosaic.version = 11 : i64} {
  func.func @_har_kernel(%arg0: i32, %arg1: memref<4x640xbf16, #tpu.memory_space<vmem>>, %arg2: memref<4x128xf32, #tpu.memory_space<vmem>>, %arg3: memref<640x128xbf16, #tpu.memory_space<vmem>>, %arg4: memref<1x128xf32, #tpu.memory_space<vmem>>, %arg5: memref<3x128x384xbf16, #tpu.memory_space<vmem>>, %arg6: memref<3x1x384xf32, #tpu.memory_space<vmem>>, %arg7: memref<3x128x128xbf16, #tpu.memory_space<vmem>>, %arg8: memref<3x1x128xf32, #tpu.memory_space<vmem>>, %arg9: memref<3x1x128xf32, #tpu.memory_space<vmem>>, %arg10: memref<3x1x128xf32, #tpu.memory_space<vmem>>, %arg11: memref<3x128x256xbf16, #tpu.memory_space<vmem>>, %arg12: memref<3x1x256xf32, #tpu.memory_space<vmem>>, %arg13: memref<3x256x128xbf16, #tpu.memory_space<vmem>>, %arg14: memref<3x1x128xf32, #tpu.memory_space<vmem>>, %arg15: memref<3x1x128xf32, #tpu.memory_space<vmem>>, %arg16: memref<3x1x128xf32, #tpu.memory_space<vmem>>, %arg17: memref<128x128xbf16, #tpu.memory_space<vmem>>, %arg18: memref<1x128xf32, #tpu.memory_space<vmem>>, %arg19: memref<128x128xbf16, #tpu.memory_space<vmem>>, %arg20: memref<1x128xf32, #tpu.memory_space<vmem>>, %arg21: memref<4x128xbf16, #tpu.memory_space<vmem>>) attributes {dimension_semantics = [#tpu.dimension_semantics<parallel>], iteration_bounds = array<i64: 1>, scalar_prefetch = 0 : i64, scratch_operands = 0 : i64, tpu.core_type = #tpu.core_type<tc>, window_params = [{transform_indices = @transform_0, window_bounds = array<i64: 4, 640>}, {pipeline_mode = #tpu.pipeline_mode<synchronous>, transform_indices = @transform_1, window_bounds = array<i64: 4, 128>}, {pipeline_mode = #tpu.pipeline_mode<synchronous>, transform_indices = @transform_2, window_bounds = array<i64: 640, 128>}, {pipeline_mode = #tpu.pipeline_mode<synchronous>, transform_indices = @transform_3, window_bounds = array<i64: 1, 128>}, {pipeline_mode = #tpu.pipeline_mode<synchronous>, transform_indices = @transform_4, window_bounds = array<i64: 3, 128, 384>}, {pipeline_mode = #tpu.pipeline_mode<synchronous>, transform_indices = @transform_5, window_bounds = array<i64: 3, 1, 384>}, {pipeline_mode = #tpu.pipeline_mode<synchronous>, transform_indices = @transform_6, window_bounds = array<i64: 3, 128, 128>}, {pipeline_mode = #tpu.pipeline_mode<synchronous>, transform_indices = @transform_7, window_bounds = array<i64: 3, 1, 128>}, {pipeline_mode = #tpu.pipeline_mode<synchronous>, transform_indices = @transform_8, window_bounds = array<i64: 3, 1, 128>}, {pipeline_mode = #tpu.pipeline_mode<synchronous>, transform_indices = @transform_9, window_bounds = array<i64: 3, 1, 128>}, {pipeline_mode = #tpu.pipeline_mode<synchronous>, transform_indices = @transform_10, window_bounds = array<i64: 3, 128, 256>}, {pipeline_mode = #tpu.pipeline_mode<synchronous>, transform_indices = @transform_11, window_bounds = array<i64: 3, 1, 256>}, {pipeline_mode = #tpu.pipeline_mode<synchronous>, transform_indices = @transform_12, window_bounds = array<i64: 3, 256, 128>}, {pipeline_mode = #tpu.pipeline_mode<synchronous>, transform_indices = @transform_13, window_bounds = array<i64: 3, 1, 128>}, {pipeline_mode = #tpu.pipeline_mode<synchronous>, transform_indices = @transform_14, window_bounds = array<i64: 3, 1, 128>}, {pipeline_mode = #tpu.pipeline_mode<synchronous>, transform_indices = @transform_15, window_bounds = array<i64: 3, 1, 128>}, {pipeline_mode = #tpu.pipeline_mode<synchronous>, transform_indices = @transform_16, window_bounds = array<i64: 128, 128>}, {pipeline_mode = #tpu.pipeline_mode<synchronous>, transform_indices = @transform_17, window_bounds = array<i64: 1, 128>}, {pipeline_mode = #tpu.pipeline_mode<synchronous>, transform_indices = @transform_18, window_bounds = array<i64: 128, 128>}, {pipeline_mode = #tpu.pipeline_mode<synchronous>, transform_indices = @transform_19, window_bounds = array<i64: 1, 128>}, {transform_indices = @transform_20, window_bounds = array<i64: 4, 128>}]} {
    %c0 = arith.constant 0 : index
    %c0_0 = arith.constant 0 : index
    %0 = vector.load %arg1[%c0, %c0_0] : memref<4x640xbf16, #tpu.memory_space<vmem>>, vector<4x640xbf16>
    %c0_1 = arith.constant 0 : index
    %c0_2 = arith.constant 0 : index
    %1 = vector.load %arg3[%c0_1, %c0_2] : memref<640x128xbf16, #tpu.memory_space<vmem>>, vector<640x128xbf16>
    %cst = arith.constant dense<0.000000e+00> : vector<4x128xf32>
    %2 = tpu.matmul %0, %1, %cst {dimension_numbers = #tpu.dot_dimension_numbers<[1], [0], [0], [1], [0, 0, 1, 1], [], []>} : vector<4x640xbf16>, vector<640x128xbf16>, vector<4x128xf32> -> vector<4x128xf32>
    %c0_3 = arith.constant 0 : index
    %c0_4 = arith.constant 0 : index
    %3 = vector.load %arg4[%c0_3, %c0_4] : memref<1x128xf32, #tpu.memory_space<vmem>>, vector<1x128xf32>
    %4 = vector.broadcast %3 : vector<1x128xf32> to vector<4x128xf32>
    %5 = arith.addf %2, %4 : vector<4x128xf32>
    %c0_5 = arith.constant 0 : index
    %c0_6 = arith.constant 0 : index
    %6 = vector.load %arg2[%c0_5, %c0_6] : memref<4x128xf32, #tpu.memory_space<vmem>>, vector<4x128xf32>
    %7 = arith.addf %5, %6 : vector<4x128xf32>
    %8 = arith.truncf %7 : vector<4x128xf32> to vector<4x128xbf16>
    %c0_7 = arith.constant 0 : index
    %c0_8 = arith.constant 0 : index
    %c0_9 = arith.constant 0 : index
    %9 = vector.load %arg5[%c0_7, %c0_8, %c0_9] : memref<3x128x384xbf16, #tpu.memory_space<vmem>>, vector<1x128x384xbf16>
    %10 = vector.shape_cast %9 : vector<1x128x384xbf16> to vector<128x384xbf16>
    %cst_10 = arith.constant dense<0.000000e+00> : vector<4x384xf32>
    %11 = tpu.matmul %8, %10, %cst_10 {dimension_numbers = #tpu.dot_dimension_numbers<[1], [0], [0], [1], [0, 0, 1, 1], [], []>} : vector<4x128xbf16>, vector<128x384xbf16>, vector<4x384xf32> -> vector<4x384xf32>
    %c0_11 = arith.constant 0 : index
    %c0_12 = arith.constant 0 : index
    %c0_13 = arith.constant 0 : index
    %12 = vector.load %arg6[%c0_11, %c0_12, %c0_13] : memref<3x1x384xf32, #tpu.memory_space<vmem>>, vector<1x1x384xf32>
    %13 = vector.shape_cast %12 : vector<1x1x384xf32> to vector<1x384xf32>
    %14 = vector.broadcast %13 : vector<1x384xf32> to vector<4x384xf32>
    %15 = arith.addf %11, %14 : vector<4x384xf32>
    %16 = vector.extract_strided_slice %15 {offsets = [0, 256], sizes = [4, 128], strides = [1, 1]} : vector<4x384xf32> to vector<4x128xf32>
    %17 = arith.truncf %16 : vector<4x128xf32> to vector<4x128xbf16>
    %c0_14 = arith.constant 0 : index
    %c0_15 = arith.constant 0 : index
    %c0_16 = arith.constant 0 : index
    %18 = vector.load %arg7[%c0_14, %c0_15, %c0_16] : memref<3x128x128xbf16, #tpu.memory_space<vmem>>, vector<1x128x128xbf16>
    %19 = vector.shape_cast %18 : vector<1x128x128xbf16> to vector<128x128xbf16>
    %cst_17 = arith.constant dense<0.000000e+00> : vector<4x128xf32>
    %20 = tpu.matmul %17, %19, %cst_17 {dimension_numbers = #tpu.dot_dimension_numbers<[1], [0], [0], [1], [0, 0, 1, 1], [], []>} : vector<4x128xbf16>, vector<128x128xbf16>, vector<4x128xf32> -> vector<4x128xf32>
    %c0_18 = arith.constant 0 : index
    %c0_19 = arith.constant 0 : index
    %c0_20 = arith.constant 0 : index
    %21 = vector.load %arg8[%c0_18, %c0_19, %c0_20] : memref<3x1x128xf32, #tpu.memory_space<vmem>>, vector<1x1x128xf32>
    %22 = vector.shape_cast %21 : vector<1x1x128xf32> to vector<1x128xf32>
    %23 = vector.broadcast %22 : vector<1x128xf32> to vector<4x128xf32>
    %24 = arith.addf %20, %23 : vector<4x128xf32>
    %25 = arith.addf %7, %24 : vector<4x128xf32>
    %c0_21 = arith.constant 0 : index
    %c0_22 = arith.constant 0 : index
    %c0_23 = arith.constant 0 : index
    %26 = vector.load %arg9[%c0_21, %c0_22, %c0_23] : memref<3x1x128xf32, #tpu.memory_space<vmem>>, vector<1x1x128xf32>
    %27 = vector.shape_cast %26 : vector<1x1x128xf32> to vector<1x128xf32>
    %c0_24 = arith.constant 0 : index
    %c0_25 = arith.constant 0 : index
    %c0_26 = arith.constant 0 : index
    %28 = vector.load %arg10[%c0_24, %c0_25, %c0_26] : memref<3x1x128xf32, #tpu.memory_space<vmem>>, vector<1x1x128xf32>
    %29 = vector.shape_cast %28 : vector<1x1x128xf32> to vector<1x128xf32>
    %cst_27 = arith.constant dense<0.000000e+00> : vector<4xf32>
    %30 = vector.multi_reduction <add>, %25, %cst_27 [1] : vector<4x128xf32> to vector<4xf32>
    %31 = vector.shape_cast %30 : vector<4xf32> to vector<4x1xf32>
    %cst_28 = arith.constant 1.280000e+02 : f32
    %32 = vector.broadcast %cst_28 : f32 to vector<4x1xf32>
    %33 = arith.divf %31, %32 : vector<4x1xf32>
    %34 = vector.broadcast %33 : vector<4x1xf32> to vector<4x128xf32>
    %35 = arith.subf %25, %34 : vector<4x128xf32>
    %36 = arith.mulf %35, %35 : vector<4x128xf32>
    %cst_29 = arith.constant dense<0.000000e+00> : vector<4xf32>
    %37 = vector.multi_reduction <add>, %36, %cst_29 [1] : vector<4x128xf32> to vector<4xf32>
    %38 = vector.shape_cast %37 : vector<4xf32> to vector<4x1xf32>
    %cst_30 = arith.constant 1.280000e+02 : f32
    %39 = vector.broadcast %cst_30 : f32 to vector<4x1xf32>
    %40 = arith.divf %38, %39 : vector<4x1xf32>
    %cst_31 = arith.constant 9.99999974E-6 : f32
    %41 = vector.broadcast %cst_31 : f32 to vector<4x1xf32>
    %42 = arith.addf %40, %41 : vector<4x1xf32>
    %43 = math.rsqrt %42 : vector<4x1xf32>
    %44 = vector.broadcast %43 : vector<4x1xf32> to vector<4x128xf32>
    %45 = arith.mulf %35, %44 : vector<4x128xf32>
    %46 = vector.broadcast %27 : vector<1x128xf32> to vector<4x128xf32>
    %47 = arith.mulf %45, %46 : vector<4x128xf32>
    %48 = vector.broadcast %29 : vector<1x128xf32> to vector<4x128xf32>
    %49 = arith.addf %47, %48 : vector<4x128xf32>
    %50 = arith.truncf %49 : vector<4x128xf32> to vector<4x128xbf16>
    %c0_32 = arith.constant 0 : index
    %c0_33 = arith.constant 0 : index
    %c0_34 = arith.constant 0 : index
    %51 = vector.load %arg11[%c0_32, %c0_33, %c0_34] : memref<3x128x256xbf16, #tpu.memory_space<vmem>>, vector<1x128x256xbf16>
    %52 = vector.shape_cast %51 : vector<1x128x256xbf16> to vector<128x256xbf16>
    %cst_35 = arith.constant dense<0.000000e+00> : vector<4x256xf32>
    %53 = tpu.matmul %50, %52, %cst_35 {dimension_numbers = #tpu.dot_dimension_numbers<[1], [0], [0], [1], [0, 0, 1, 1], [], []>} : vector<4x128xbf16>, vector<128x256xbf16>, vector<4x256xf32> -> vector<4x256xf32>
    %c0_36 = arith.constant 0 : index
    %c0_37 = arith.constant 0 : index
    %c0_38 = arith.constant 0 : index
    %54 = vector.load %arg12[%c0_36, %c0_37, %c0_38] : memref<3x1x256xf32, #tpu.memory_space<vmem>>, vector<1x1x256xf32>
    %55 = vector.shape_cast %54 : vector<1x1x256xf32> to vector<1x256xf32>
    %56 = vector.broadcast %55 : vector<1x256xf32> to vector<4x256xf32>
    %57 = arith.addf %53, %56 : vector<4x256xf32>
    %cst_39 = arith.constant 0.000000e+00 : f32
    %58 = vector.broadcast %cst_39 : f32 to vector<4x256xf32>
    %59 = arith.maximumf %57, %58 : vector<4x256xf32>
    %60 = arith.truncf %59 : vector<4x256xf32> to vector<4x256xbf16>
    %c0_40 = arith.constant 0 : index
    %c0_41 = arith.constant 0 : index
    %c0_42 = arith.constant 0 : index
    %61 = vector.load %arg13[%c0_40, %c0_41, %c0_42] : memref<3x256x128xbf16, #tpu.memory_space<vmem>>, vector<1x256x128xbf16>
    %62 = vector.shape_cast %61 : vector<1x256x128xbf16> to vector<256x128xbf16>
    %cst_43 = arith.constant dense<0.000000e+00> : vector<4x128xf32>
    %63 = tpu.matmul %60, %62, %cst_43 {dimension_numbers = #tpu.dot_dimension_numbers<[1], [0], [0], [1], [0, 0, 1, 1], [], []>} : vector<4x256xbf16>, vector<256x128xbf16>, vector<4x128xf32> -> vector<4x128xf32>
    %c0_44 = arith.constant 0 : index
    %c0_45 = arith.constant 0 : index
    %c0_46 = arith.constant 0 : index
    %64 = vector.load %arg14[%c0_44, %c0_45, %c0_46] : memref<3x1x128xf32, #tpu.memory_space<vmem>>, vector<1x1x128xf32>
    %65 = vector.shape_cast %64 : vector<1x1x128xf32> to vector<1x128xf32>
    %66 = vector.broadcast %65 : vector<1x128xf32> to vector<4x128xf32>
    %67 = arith.addf %63, %66 : vector<4x128xf32>
    %68 = arith.addf %49, %67 : vector<4x128xf32>
    %c0_47 = arith.constant 0 : index
    %c0_48 = arith.constant 0 : index
    %c0_49 = arith.constant 0 : index
    %69 = vector.load %arg15[%c0_47, %c0_48, %c0_49] : memref<3x1x128xf32, #tpu.memory_space<vmem>>, vector<1x1x128xf32>
    %70 = vector.shape_cast %69 : vector<1x1x128xf32> to vector<1x128xf32>
    %c0_50 = arith.constant 0 : index
    %c0_51 = arith.constant 0 : index
    %c0_52 = arith.constant 0 : index
    %71 = vector.load %arg16[%c0_50, %c0_51, %c0_52] : memref<3x1x128xf32, #tpu.memory_space<vmem>>, vector<1x1x128xf32>
    %72 = vector.shape_cast %71 : vector<1x1x128xf32> to vector<1x128xf32>
    %cst_53 = arith.constant dense<0.000000e+00> : vector<4xf32>
    %73 = vector.multi_reduction <add>, %68, %cst_53 [1] : vector<4x128xf32> to vector<4xf32>
    %74 = vector.shape_cast %73 : vector<4xf32> to vector<4x1xf32>
    %cst_54 = arith.constant 1.280000e+02 : f32
    %75 = vector.broadcast %cst_54 : f32 to vector<4x1xf32>
    %76 = arith.divf %74, %75 : vector<4x1xf32>
    %77 = vector.broadcast %76 : vector<4x1xf32> to vector<4x128xf32>
    %78 = arith.subf %68, %77 : vector<4x128xf32>
    %79 = arith.mulf %78, %78 : vector<4x128xf32>
    %cst_55 = arith.constant dense<0.000000e+00> : vector<4xf32>
    %80 = vector.multi_reduction <add>, %79, %cst_55 [1] : vector<4x128xf32> to vector<4xf32>
    %81 = vector.shape_cast %80 : vector<4xf32> to vector<4x1xf32>
    %cst_56 = arith.constant 1.280000e+02 : f32
    %82 = vector.broadcast %cst_56 : f32 to vector<4x1xf32>
    %83 = arith.divf %81, %82 : vector<4x1xf32>
    %cst_57 = arith.constant 9.99999974E-6 : f32
    %84 = vector.broadcast %cst_57 : f32 to vector<4x1xf32>
    %85 = arith.addf %83, %84 : vector<4x1xf32>
    %86 = math.rsqrt %85 : vector<4x1xf32>
    %87 = vector.broadcast %86 : vector<4x1xf32> to vector<4x128xf32>
    %88 = arith.mulf %78, %87 : vector<4x128xf32>
    %89 = vector.broadcast %70 : vector<1x128xf32> to vector<4x128xf32>
    %90 = arith.mulf %88, %89 : vector<4x128xf32>
    %91 = vector.broadcast %72 : vector<1x128xf32> to vector<4x128xf32>
    %92 = arith.addf %90, %91 : vector<4x128xf32>
    %93 = arith.truncf %92 : vector<4x128xf32> to vector<4x128xbf16>
    %c1 = arith.constant 1 : index
    %c0_58 = arith.constant 0 : index
    %c0_59 = arith.constant 0 : index
    %94 = vector.load %arg5[%c1, %c0_58, %c0_59] : memref<3x128x384xbf16, #tpu.memory_space<vmem>>, vector<1x128x384xbf16>
    %95 = vector.shape_cast %94 : vector<1x128x384xbf16> to vector<128x384xbf16>
    %cst_60 = arith.constant dense<0.000000e+00> : vector<4x384xf32>
    %96 = tpu.matmul %93, %95, %cst_60 {dimension_numbers = #tpu.dot_dimension_numbers<[1], [0], [0], [1], [0, 0, 1, 1], [], []>} : vector<4x128xbf16>, vector<128x384xbf16>, vector<4x384xf32> -> vector<4x384xf32>
    %c1_61 = arith.constant 1 : index
    %c0_62 = arith.constant 0 : index
    %c0_63 = arith.constant 0 : index
    %97 = vector.load %arg6[%c1_61, %c0_62, %c0_63] : memref<3x1x384xf32, #tpu.memory_space<vmem>>, vector<1x1x384xf32>
    %98 = vector.shape_cast %97 : vector<1x1x384xf32> to vector<1x384xf32>
    %99 = vector.broadcast %98 : vector<1x384xf32> to vector<4x384xf32>
    %100 = arith.addf %96, %99 : vector<4x384xf32>
    %101 = vector.extract_strided_slice %100 {offsets = [0, 256], sizes = [4, 128], strides = [1, 1]} : vector<4x384xf32> to vector<4x128xf32>
    %102 = arith.truncf %101 : vector<4x128xf32> to vector<4x128xbf16>
    %c1_64 = arith.constant 1 : index
    %c0_65 = arith.constant 0 : index
    %c0_66 = arith.constant 0 : index
    %103 = vector.load %arg7[%c1_64, %c0_65, %c0_66] : memref<3x128x128xbf16, #tpu.memory_space<vmem>>, vector<1x128x128xbf16>
    %104 = vector.shape_cast %103 : vector<1x128x128xbf16> to vector<128x128xbf16>
    %cst_67 = arith.constant dense<0.000000e+00> : vector<4x128xf32>
    %105 = tpu.matmul %102, %104, %cst_67 {dimension_numbers = #tpu.dot_dimension_numbers<[1], [0], [0], [1], [0, 0, 1, 1], [], []>} : vector<4x128xbf16>, vector<128x128xbf16>, vector<4x128xf32> -> vector<4x128xf32>
    %c1_68 = arith.constant 1 : index
    %c0_69 = arith.constant 0 : index
    %c0_70 = arith.constant 0 : index
    %106 = vector.load %arg8[%c1_68, %c0_69, %c0_70] : memref<3x1x128xf32, #tpu.memory_space<vmem>>, vector<1x1x128xf32>
    %107 = vector.shape_cast %106 : vector<1x1x128xf32> to vector<1x128xf32>
    %108 = vector.broadcast %107 : vector<1x128xf32> to vector<4x128xf32>
    %109 = arith.addf %105, %108 : vector<4x128xf32>
    %110 = arith.addf %92, %109 : vector<4x128xf32>
    %c1_71 = arith.constant 1 : index
    %c0_72 = arith.constant 0 : index
    %c0_73 = arith.constant 0 : index
    %111 = vector.load %arg9[%c1_71, %c0_72, %c0_73] : memref<3x1x128xf32, #tpu.memory_space<vmem>>, vector<1x1x128xf32>
    %112 = vector.shape_cast %111 : vector<1x1x128xf32> to vector<1x128xf32>
    %c1_74 = arith.constant 1 : index
    %c0_75 = arith.constant 0 : index
    %c0_76 = arith.constant 0 : index
    %113 = vector.load %arg10[%c1_74, %c0_75, %c0_76] : memref<3x1x128xf32, #tpu.memory_space<vmem>>, vector<1x1x128xf32>
    %114 = vector.shape_cast %113 : vector<1x1x128xf32> to vector<1x128xf32>
    %cst_77 = arith.constant dense<0.000000e+00> : vector<4xf32>
    %115 = vector.multi_reduction <add>, %110, %cst_77 [1] : vector<4x128xf32> to vector<4xf32>
    %116 = vector.shape_cast %115 : vector<4xf32> to vector<4x1xf32>
    %cst_78 = arith.constant 1.280000e+02 : f32
    %117 = vector.broadcast %cst_78 : f32 to vector<4x1xf32>
    %118 = arith.divf %116, %117 : vector<4x1xf32>
    %119 = vector.broadcast %118 : vector<4x1xf32> to vector<4x128xf32>
    %120 = arith.subf %110, %119 : vector<4x128xf32>
    %121 = arith.mulf %120, %120 : vector<4x128xf32>
    %cst_79 = arith.constant dense<0.000000e+00> : vector<4xf32>
    %122 = vector.multi_reduction <add>, %121, %cst_79 [1] : vector<4x128xf32> to vector<4xf32>
    %123 = vector.shape_cast %122 : vector<4xf32> to vector<4x1xf32>
    %cst_80 = arith.constant 1.280000e+02 : f32
    %124 = vector.broadcast %cst_80 : f32 to vector<4x1xf32>
    %125 = arith.divf %123, %124 : vector<4x1xf32>
    %cst_81 = arith.constant 9.99999974E-6 : f32
    %126 = vector.broadcast %cst_81 : f32 to vector<4x1xf32>
    %127 = arith.addf %125, %126 : vector<4x1xf32>
    %128 = math.rsqrt %127 : vector<4x1xf32>
    %129 = vector.broadcast %128 : vector<4x1xf32> to vector<4x128xf32>
    %130 = arith.mulf %120, %129 : vector<4x128xf32>
    %131 = vector.broadcast %112 : vector<1x128xf32> to vector<4x128xf32>
    %132 = arith.mulf %130, %131 : vector<4x128xf32>
    %133 = vector.broadcast %114 : vector<1x128xf32> to vector<4x128xf32>
    %134 = arith.addf %132, %133 : vector<4x128xf32>
    %135 = arith.truncf %134 : vector<4x128xf32> to vector<4x128xbf16>
    %c1_82 = arith.constant 1 : index
    %c0_83 = arith.constant 0 : index
    %c0_84 = arith.constant 0 : index
    %136 = vector.load %arg11[%c1_82, %c0_83, %c0_84] : memref<3x128x256xbf16, #tpu.memory_space<vmem>>, vector<1x128x256xbf16>
    %137 = vector.shape_cast %136 : vector<1x128x256xbf16> to vector<128x256xbf16>
    %cst_85 = arith.constant dense<0.000000e+00> : vector<4x256xf32>
    %138 = tpu.matmul %135, %137, %cst_85 {dimension_numbers = #tpu.dot_dimension_numbers<[1], [0], [0], [1], [0, 0, 1, 1], [], []>} : vector<4x128xbf16>, vector<128x256xbf16>, vector<4x256xf32> -> vector<4x256xf32>
    %c1_86 = arith.constant 1 : index
    %c0_87 = arith.constant 0 : index
    %c0_88 = arith.constant 0 : index
    %139 = vector.load %arg12[%c1_86, %c0_87, %c0_88] : memref<3x1x256xf32, #tpu.memory_space<vmem>>, vector<1x1x256xf32>
    %140 = vector.shape_cast %139 : vector<1x1x256xf32> to vector<1x256xf32>
    %141 = vector.broadcast %140 : vector<1x256xf32> to vector<4x256xf32>
    %142 = arith.addf %138, %141 : vector<4x256xf32>
    %cst_89 = arith.constant 0.000000e+00 : f32
    %143 = vector.broadcast %cst_89 : f32 to vector<4x256xf32>
    %144 = arith.maximumf %142, %143 : vector<4x256xf32>
    %145 = arith.truncf %144 : vector<4x256xf32> to vector<4x256xbf16>
    %c1_90 = arith.constant 1 : index
    %c0_91 = arith.constant 0 : index
    %c0_92 = arith.constant 0 : index
    %146 = vector.load %arg13[%c1_90, %c0_91, %c0_92] : memref<3x256x128xbf16, #tpu.memory_space<vmem>>, vector<1x256x128xbf16>
    %147 = vector.shape_cast %146 : vector<1x256x128xbf16> to vector<256x128xbf16>
    %cst_93 = arith.constant dense<0.000000e+00> : vector<4x128xf32>
    %148 = tpu.matmul %145, %147, %cst_93 {dimension_numbers = #tpu.dot_dimension_numbers<[1], [0], [0], [1], [0, 0, 1, 1], [], []>} : vector<4x256xbf16>, vector<256x128xbf16>, vector<4x128xf32> -> vector<4x128xf32>
    %c1_94 = arith.constant 1 : index
    %c0_95 = arith.constant 0 : index
    %c0_96 = arith.constant 0 : index
    %149 = vector.load %arg14[%c1_94, %c0_95, %c0_96] : memref<3x1x128xf32, #tpu.memory_space<vmem>>, vector<1x1x128xf32>
    %150 = vector.shape_cast %149 : vector<1x1x128xf32> to vector<1x128xf32>
    %151 = vector.broadcast %150 : vector<1x128xf32> to vector<4x128xf32>
    %152 = arith.addf %148, %151 : vector<4x128xf32>
    %153 = arith.addf %134, %152 : vector<4x128xf32>
    %c1_97 = arith.constant 1 : index
    %c0_98 = arith.constant 0 : index
    %c0_99 = arith.constant 0 : index
    %154 = vector.load %arg15[%c1_97, %c0_98, %c0_99] : memref<3x1x128xf32, #tpu.memory_space<vmem>>, vector<1x1x128xf32>
    %155 = vector.shape_cast %154 : vector<1x1x128xf32> to vector<1x128xf32>
    %c1_100 = arith.constant 1 : index
    %c0_101 = arith.constant 0 : index
    %c0_102 = arith.constant 0 : index
    %156 = vector.load %arg16[%c1_100, %c0_101, %c0_102] : memref<3x1x128xf32, #tpu.memory_space<vmem>>, vector<1x1x128xf32>
    %157 = vector.shape_cast %156 : vector<1x1x128xf32> to vector<1x128xf32>
    %cst_103 = arith.constant dense<0.000000e+00> : vector<4xf32>
    %158 = vector.multi_reduction <add>, %153, %cst_103 [1] : vector<4x128xf32> to vector<4xf32>
    %159 = vector.shape_cast %158 : vector<4xf32> to vector<4x1xf32>
    %cst_104 = arith.constant 1.280000e+02 : f32
    %160 = vector.broadcast %cst_104 : f32 to vector<4x1xf32>
    %161 = arith.divf %159, %160 : vector<4x1xf32>
    %162 = vector.broadcast %161 : vector<4x1xf32> to vector<4x128xf32>
    %163 = arith.subf %153, %162 : vector<4x128xf32>
    %164 = arith.mulf %163, %163 : vector<4x128xf32>
    %cst_105 = arith.constant dense<0.000000e+00> : vector<4xf32>
    %165 = vector.multi_reduction <add>, %164, %cst_105 [1] : vector<4x128xf32> to vector<4xf32>
    %166 = vector.shape_cast %165 : vector<4xf32> to vector<4x1xf32>
    %cst_106 = arith.constant 1.280000e+02 : f32
    %167 = vector.broadcast %cst_106 : f32 to vector<4x1xf32>
    %168 = arith.divf %166, %167 : vector<4x1xf32>
    %cst_107 = arith.constant 9.99999974E-6 : f32
    %169 = vector.broadcast %cst_107 : f32 to vector<4x1xf32>
    %170 = arith.addf %168, %169 : vector<4x1xf32>
    %171 = math.rsqrt %170 : vector<4x1xf32>
    %172 = vector.broadcast %171 : vector<4x1xf32> to vector<4x128xf32>
    %173 = arith.mulf %163, %172 : vector<4x128xf32>
    %174 = vector.broadcast %155 : vector<1x128xf32> to vector<4x128xf32>
    %175 = arith.mulf %173, %174 : vector<4x128xf32>
    %176 = vector.broadcast %157 : vector<1x128xf32> to vector<4x128xf32>
    %177 = arith.addf %175, %176 : vector<4x128xf32>
    %178 = arith.truncf %177 : vector<4x128xf32> to vector<4x128xbf16>
    %c2 = arith.constant 2 : index
    %c0_108 = arith.constant 0 : index
    %c0_109 = arith.constant 0 : index
    %179 = vector.load %arg5[%c2, %c0_108, %c0_109] : memref<3x128x384xbf16, #tpu.memory_space<vmem>>, vector<1x128x384xbf16>
    %180 = vector.shape_cast %179 : vector<1x128x384xbf16> to vector<128x384xbf16>
    %cst_110 = arith.constant dense<0.000000e+00> : vector<4x384xf32>
    %181 = tpu.matmul %178, %180, %cst_110 {dimension_numbers = #tpu.dot_dimension_numbers<[1], [0], [0], [1], [0, 0, 1, 1], [], []>} : vector<4x128xbf16>, vector<128x384xbf16>, vector<4x384xf32> -> vector<4x384xf32>
    %c2_111 = arith.constant 2 : index
    %c0_112 = arith.constant 0 : index
    %c0_113 = arith.constant 0 : index
    %182 = vector.load %arg6[%c2_111, %c0_112, %c0_113] : memref<3x1x384xf32, #tpu.memory_space<vmem>>, vector<1x1x384xf32>
    %183 = vector.shape_cast %182 : vector<1x1x384xf32> to vector<1x384xf32>
    %184 = vector.broadcast %183 : vector<1x384xf32> to vector<4x384xf32>
    %185 = arith.addf %181, %184 : vector<4x384xf32>
    %186 = vector.extract_strided_slice %185 {offsets = [0, 256], sizes = [4, 128], strides = [1, 1]} : vector<4x384xf32> to vector<4x128xf32>
    %187 = arith.truncf %186 : vector<4x128xf32> to vector<4x128xbf16>
    %c2_114 = arith.constant 2 : index
    %c0_115 = arith.constant 0 : index
    %c0_116 = arith.constant 0 : index
    %188 = vector.load %arg7[%c2_114, %c0_115, %c0_116] : memref<3x128x128xbf16, #tpu.memory_space<vmem>>, vector<1x128x128xbf16>
    %189 = vector.shape_cast %188 : vector<1x128x128xbf16> to vector<128x128xbf16>
    %cst_117 = arith.constant dense<0.000000e+00> : vector<4x128xf32>
    %190 = tpu.matmul %187, %189, %cst_117 {dimension_numbers = #tpu.dot_dimension_numbers<[1], [0], [0], [1], [0, 0, 1, 1], [], []>} : vector<4x128xbf16>, vector<128x128xbf16>, vector<4x128xf32> -> vector<4x128xf32>
    %c2_118 = arith.constant 2 : index
    %c0_119 = arith.constant 0 : index
    %c0_120 = arith.constant 0 : index
    %191 = vector.load %arg8[%c2_118, %c0_119, %c0_120] : memref<3x1x128xf32, #tpu.memory_space<vmem>>, vector<1x1x128xf32>
    %192 = vector.shape_cast %191 : vector<1x1x128xf32> to vector<1x128xf32>
    %193 = vector.broadcast %192 : vector<1x128xf32> to vector<4x128xf32>
    %194 = arith.addf %190, %193 : vector<4x128xf32>
    %195 = arith.addf %177, %194 : vector<4x128xf32>
    %c2_121 = arith.constant 2 : index
    %c0_122 = arith.constant 0 : index
    %c0_123 = arith.constant 0 : index
    %196 = vector.load %arg9[%c2_121, %c0_122, %c0_123] : memref<3x1x128xf32, #tpu.memory_space<vmem>>, vector<1x1x128xf32>
    %197 = vector.shape_cast %196 : vector<1x1x128xf32> to vector<1x128xf32>
    %c2_124 = arith.constant 2 : index
    %c0_125 = arith.constant 0 : index
    %c0_126 = arith.constant 0 : index
    %198 = vector.load %arg10[%c2_124, %c0_125, %c0_126] : memref<3x1x128xf32, #tpu.memory_space<vmem>>, vector<1x1x128xf32>
    %199 = vector.shape_cast %198 : vector<1x1x128xf32> to vector<1x128xf32>
    %cst_127 = arith.constant dense<0.000000e+00> : vector<4xf32>
    %200 = vector.multi_reduction <add>, %195, %cst_127 [1] : vector<4x128xf32> to vector<4xf32>
    %201 = vector.shape_cast %200 : vector<4xf32> to vector<4x1xf32>
    %cst_128 = arith.constant 1.280000e+02 : f32
    %202 = vector.broadcast %cst_128 : f32 to vector<4x1xf32>
    %203 = arith.divf %201, %202 : vector<4x1xf32>
    %204 = vector.broadcast %203 : vector<4x1xf32> to vector<4x128xf32>
    %205 = arith.subf %195, %204 : vector<4x128xf32>
    %206 = arith.mulf %205, %205 : vector<4x128xf32>
    %cst_129 = arith.constant dense<0.000000e+00> : vector<4xf32>
    %207 = vector.multi_reduction <add>, %206, %cst_129 [1] : vector<4x128xf32> to vector<4xf32>
    %208 = vector.shape_cast %207 : vector<4xf32> to vector<4x1xf32>
    %cst_130 = arith.constant 1.280000e+02 : f32
    %209 = vector.broadcast %cst_130 : f32 to vector<4x1xf32>
    %210 = arith.divf %208, %209 : vector<4x1xf32>
    %cst_131 = arith.constant 9.99999974E-6 : f32
    %211 = vector.broadcast %cst_131 : f32 to vector<4x1xf32>
    %212 = arith.addf %210, %211 : vector<4x1xf32>
    %213 = math.rsqrt %212 : vector<4x1xf32>
    %214 = vector.broadcast %213 : vector<4x1xf32> to vector<4x128xf32>
    %215 = arith.mulf %205, %214 : vector<4x128xf32>
    %216 = vector.broadcast %197 : vector<1x128xf32> to vector<4x128xf32>
    %217 = arith.mulf %215, %216 : vector<4x128xf32>
    %218 = vector.broadcast %199 : vector<1x128xf32> to vector<4x128xf32>
    %219 = arith.addf %217, %218 : vector<4x128xf32>
    %220 = arith.truncf %219 : vector<4x128xf32> to vector<4x128xbf16>
    %c2_132 = arith.constant 2 : index
    %c0_133 = arith.constant 0 : index
    %c0_134 = arith.constant 0 : index
    %221 = vector.load %arg11[%c2_132, %c0_133, %c0_134] : memref<3x128x256xbf16, #tpu.memory_space<vmem>>, vector<1x128x256xbf16>
    %222 = vector.shape_cast %221 : vector<1x128x256xbf16> to vector<128x256xbf16>
    %cst_135 = arith.constant dense<0.000000e+00> : vector<4x256xf32>
    %223 = tpu.matmul %220, %222, %cst_135 {dimension_numbers = #tpu.dot_dimension_numbers<[1], [0], [0], [1], [0, 0, 1, 1], [], []>} : vector<4x128xbf16>, vector<128x256xbf16>, vector<4x256xf32> -> vector<4x256xf32>
    %c2_136 = arith.constant 2 : index
    %c0_137 = arith.constant 0 : index
    %c0_138 = arith.constant 0 : index
    %224 = vector.load %arg12[%c2_136, %c0_137, %c0_138] : memref<3x1x256xf32, #tpu.memory_space<vmem>>, vector<1x1x256xf32>
    %225 = vector.shape_cast %224 : vector<1x1x256xf32> to vector<1x256xf32>
    %226 = vector.broadcast %225 : vector<1x256xf32> to vector<4x256xf32>
    %227 = arith.addf %223, %226 : vector<4x256xf32>
    %cst_139 = arith.constant 0.000000e+00 : f32
    %228 = vector.broadcast %cst_139 : f32 to vector<4x256xf32>
    %229 = arith.maximumf %227, %228 : vector<4x256xf32>
    %230 = arith.truncf %229 : vector<4x256xf32> to vector<4x256xbf16>
    %c2_140 = arith.constant 2 : index
    %c0_141 = arith.constant 0 : index
    %c0_142 = arith.constant 0 : index
    %231 = vector.load %arg13[%c2_140, %c0_141, %c0_142] : memref<3x256x128xbf16, #tpu.memory_space<vmem>>, vector<1x256x128xbf16>
    %232 = vector.shape_cast %231 : vector<1x256x128xbf16> to vector<256x128xbf16>
    %cst_143 = arith.constant dense<0.000000e+00> : vector<4x128xf32>
    %233 = tpu.matmul %230, %232, %cst_143 {dimension_numbers = #tpu.dot_dimension_numbers<[1], [0], [0], [1], [0, 0, 1, 1], [], []>} : vector<4x256xbf16>, vector<256x128xbf16>, vector<4x128xf32> -> vector<4x128xf32>
    %c2_144 = arith.constant 2 : index
    %c0_145 = arith.constant 0 : index
    %c0_146 = arith.constant 0 : index
    %234 = vector.load %arg14[%c2_144, %c0_145, %c0_146] : memref<3x1x128xf32, #tpu.memory_space<vmem>>, vector<1x1x128xf32>
    %235 = vector.shape_cast %234 : vector<1x1x128xf32> to vector<1x128xf32>
    %236 = vector.broadcast %235 : vector<1x128xf32> to vector<4x128xf32>
    %237 = arith.addf %233, %236 : vector<4x128xf32>
    %238 = arith.addf %219, %237 : vector<4x128xf32>
    %c2_147 = arith.constant 2 : index
    %c0_148 = arith.constant 0 : index
    %c0_149 = arith.constant 0 : index
    %239 = vector.load %arg15[%c2_147, %c0_148, %c0_149] : memref<3x1x128xf32, #tpu.memory_space<vmem>>, vector<1x1x128xf32>
    %240 = vector.shape_cast %239 : vector<1x1x128xf32> to vector<1x128xf32>
    %c2_150 = arith.constant 2 : index
    %c0_151 = arith.constant 0 : index
    %c0_152 = arith.constant 0 : index
    %241 = vector.load %arg16[%c2_150, %c0_151, %c0_152] : memref<3x1x128xf32, #tpu.memory_space<vmem>>, vector<1x1x128xf32>
    %242 = vector.shape_cast %241 : vector<1x1x128xf32> to vector<1x128xf32>
    %cst_153 = arith.constant dense<0.000000e+00> : vector<4xf32>
    %243 = vector.multi_reduction <add>, %238, %cst_153 [1] : vector<4x128xf32> to vector<4xf32>
    %244 = vector.shape_cast %243 : vector<4xf32> to vector<4x1xf32>
    %cst_154 = arith.constant 1.280000e+02 : f32
    %245 = vector.broadcast %cst_154 : f32 to vector<4x1xf32>
    %246 = arith.divf %244, %245 : vector<4x1xf32>
    %247 = vector.broadcast %246 : vector<4x1xf32> to vector<4x128xf32>
    %248 = arith.subf %238, %247 : vector<4x128xf32>
    %249 = arith.mulf %248, %248 : vector<4x128xf32>
    %cst_155 = arith.constant dense<0.000000e+00> : vector<4xf32>
    %250 = vector.multi_reduction <add>, %249, %cst_155 [1] : vector<4x128xf32> to vector<4xf32>
    %251 = vector.shape_cast %250 : vector<4xf32> to vector<4x1xf32>
    %cst_156 = arith.constant 1.280000e+02 : f32
    %252 = vector.broadcast %cst_156 : f32 to vector<4x1xf32>
    %253 = arith.divf %251, %252 : vector<4x1xf32>
    %cst_157 = arith.constant 9.99999974E-6 : f32
    %254 = vector.broadcast %cst_157 : f32 to vector<4x1xf32>
    %255 = arith.addf %253, %254 : vector<4x1xf32>
    %256 = math.rsqrt %255 : vector<4x1xf32>
    %257 = vector.broadcast %256 : vector<4x1xf32> to vector<4x128xf32>
    %258 = arith.mulf %248, %257 : vector<4x128xf32>
    %259 = vector.broadcast %240 : vector<1x128xf32> to vector<4x128xf32>
    %260 = arith.mulf %258, %259 : vector<4x128xf32>
    %261 = vector.broadcast %242 : vector<1x128xf32> to vector<4x128xf32>
    %262 = arith.addf %260, %261 : vector<4x128xf32>
    %263 = arith.truncf %262 : vector<4x128xf32> to vector<4x128xbf16>
    %c0_158 = arith.constant 0 : index
    %c0_159 = arith.constant 0 : index
    %264 = vector.load %arg17[%c0_158, %c0_159] : memref<128x128xbf16, #tpu.memory_space<vmem>>, vector<128x128xbf16>
    %cst_160 = arith.constant dense<0.000000e+00> : vector<4x128xf32>
    %265 = tpu.matmul %263, %264, %cst_160 {dimension_numbers = #tpu.dot_dimension_numbers<[1], [0], [0], [1], [0, 0, 1, 1], [], []>} : vector<4x128xbf16>, vector<128x128xbf16>, vector<4x128xf32> -> vector<4x128xf32>
    %c0_161 = arith.constant 0 : index
    %c0_162 = arith.constant 0 : index
    %266 = vector.load %arg18[%c0_161, %c0_162] : memref<1x128xf32, #tpu.memory_space<vmem>>, vector<1x128xf32>
    %267 = vector.broadcast %266 : vector<1x128xf32> to vector<4x128xf32>
    %268 = arith.addf %265, %267 : vector<4x128xf32>
    %cst_163 = arith.constant 0.000000e+00 : f32
    %269 = vector.broadcast %cst_163 : f32 to vector<4x128xf32>
    %270 = arith.maximumf %268, %269 : vector<4x128xf32>
    %271 = arith.truncf %270 : vector<4x128xf32> to vector<4x128xbf16>
    %c0_164 = arith.constant 0 : index
    %c0_165 = arith.constant 0 : index
    %272 = vector.load %arg19[%c0_164, %c0_165] : memref<128x128xbf16, #tpu.memory_space<vmem>>, vector<128x128xbf16>
    %cst_166 = arith.constant dense<0.000000e+00> : vector<4x128xf32>
    %273 = tpu.matmul %271, %272, %cst_166 {dimension_numbers = #tpu.dot_dimension_numbers<[1], [0], [0], [1], [0, 0, 1, 1], [], []>} : vector<4x128xbf16>, vector<128x128xbf16>, vector<4x128xf32> -> vector<4x128xf32>
    %c0_167 = arith.constant 0 : index
    %c0_168 = arith.constant 0 : index
    %274 = vector.load %arg20[%c0_167, %c0_168] : memref<1x128xf32, #tpu.memory_space<vmem>>, vector<1x128xf32>
    %275 = vector.broadcast %274 : vector<1x128xf32> to vector<4x128xf32>
    %276 = arith.addf %273, %275 : vector<4x128xf32>
    %277 = arith.truncf %276 : vector<4x128xf32> to vector<4x128xbf16>
    %c0_169 = arith.constant 0 : index
    %c0_170 = arith.constant 0 : index
    %278 = vector.load %arg21[%c0_169, %c0_170] : memref<4x128xbf16, #tpu.memory_space<vmem>>, vector<4x128xbf16>
    tpu.vector_store %arg21[%c0_169, %c0_170], %277 {strides = array<i32>} : memref<4x128xbf16, #tpu.memory_space<vmem>>, vector<4x128xbf16>,
    return
  }
  func.func @transform_0(%arg0: i32) -> (i32, i32) {
    %c0_i32 = arith.constant 0 : i32
    %c0_i32_0 = arith.constant 0 : i32
    return %arg0, %c0_i32 : i32, i32
  }
  func.func @transform_1(%arg0: i32) -> (i32, i32) {
    %c0_i32 = arith.constant 0 : i32
    %c0_i32_0 = arith.constant 0 : i32
    %c0_i32_1 = arith.constant 0 : i32
    return %c0_i32, %c0_i32_0 : i32, i32
  }
  func.func @transform_2(%arg0: i32) -> (i32, i32) {
    %c0_i32 = arith.constant 0 : i32
    %c0_i32_0 = arith.constant 0 : i32
    %c0_i32_1 = arith.constant 0 : i32
    return %c0_i32, %c0_i32_0 : i32, i32
  }
  func.func @transform_3(%arg0: i32) -> (i32, i32) {
    %c0_i32 = arith.constant 0 : i32
    %c0_i32_0 = arith.constant 0 : i32
    %c0_i32_1 = arith.constant 0 : i32
    return %c0_i32, %c0_i32_0 : i32, i32
  }
  func.func @transform_4(%arg0: i32) -> (i32, i32, i32) {
    %c0_i32 = arith.constant 0 : i32
    %c0_i32_0 = arith.constant 0 : i32
    %c0_i32_1 = arith.constant 0 : i32
    %c0_i32_2 = arith.constant 0 : i32
    return %c0_i32, %c0_i32_0, %c0_i32_1 : i32, i32, i32
  }
  func.func @transform_5(%arg0: i32) -> (i32, i32, i32) {
    %c0_i32 = arith.constant 0 : i32
    %c0_i32_0 = arith.constant 0 : i32
    %c0_i32_1 = arith.constant 0 : i32
    %c0_i32_2 = arith.constant 0 : i32
    return %c0_i32, %c0_i32_0, %c0_i32_1 : i32, i32, i32
  }
  func.func @transform_6(%arg0: i32) -> (i32, i32, i32) {
    %c0_i32 = arith.constant 0 : i32
    %c0_i32_0 = arith.constant 0 : i32
    %c0_i32_1 = arith.constant 0 : i32
    %c0_i32_2 = arith.constant 0 : i32
    return %c0_i32, %c0_i32_0, %c0_i32_1 : i32, i32, i32
  }
  func.func @transform_7(%arg0: i32) -> (i32, i32, i32) {
    %c0_i32 = arith.constant 0 : i32
    %c0_i32_0 = arith.constant 0 : i32
    %c0_i32_1 = arith.constant 0 : i32
    %c0_i32_2 = arith.constant 0 : i32
    return %c0_i32, %c0_i32_0, %c0_i32_1 : i32, i32, i32
  }
  func.func @transform_8(%arg0: i32) -> (i32, i32, i32) {
    %c0_i32 = arith.constant 0 : i32
    %c0_i32_0 = arith.constant 0 : i32
    %c0_i32_1 = arith.constant 0 : i32
    %c0_i32_2 = arith.constant 0 : i32
    return %c0_i32, %c0_i32_0, %c0_i32_1 : i32, i32, i32
  }
  func.func @transform_9(%arg0: i32) -> (i32, i32, i32) {
    %c0_i32 = arith.constant 0 : i32
    %c0_i32_0 = arith.constant 0 : i32
    %c0_i32_1 = arith.constant 0 : i32
    %c0_i32_2 = arith.constant 0 : i32
    return %c0_i32, %c0_i32_0, %c0_i32_1 : i32, i32, i32
  }
  func.func @transform_10(%arg0: i32) -> (i32, i32, i32) {
    %c0_i32 = arith.constant 0 : i32
    %c0_i32_0 = arith.constant 0 : i32
    %c0_i32_1 = arith.constant 0 : i32
    %c0_i32_2 = arith.constant 0 : i32
    return %c0_i32, %c0_i32_0, %c0_i32_1 : i32, i32, i32
  }
  func.func @transform_11(%arg0: i32) -> (i32, i32, i32) {
    %c0_i32 = arith.constant 0 : i32
    %c0_i32_0 = arith.constant 0 : i32
    %c0_i32_1 = arith.constant 0 : i32
    %c0_i32_2 = arith.constant 0 : i32
    return %c0_i32, %c0_i32_0, %c0_i32_1 : i32, i32, i32
  }
  func.func @transform_12(%arg0: i32) -> (i32, i32, i32) {
    %c0_i32 = arith.constant 0 : i32
    %c0_i32_0 = arith.constant 0 : i32
    %c0_i32_1 = arith.constant 0 : i32
    %c0_i32_2 = arith.constant 0 : i32
    return %c0_i32, %c0_i32_0, %c0_i32_1 : i32, i32, i32
  }
  func.func @transform_13(%arg0: i32) -> (i32, i32, i32) {
    %c0_i32 = arith.constant 0 : i32
    %c0_i32_0 = arith.constant 0 : i32
    %c0_i32_1 = arith.constant 0 : i32
    %c0_i32_2 = arith.constant 0 : i32
    return %c0_i32, %c0_i32_0, %c0_i32_1 : i32, i32, i32
  }
  func.func @transform_14(%arg0: i32) -> (i32, i32, i32) {
    %c0_i32 = arith.constant 0 : i32
    %c0_i32_0 = arith.constant 0 : i32
    %c0_i32_1 = arith.constant 0 : i32
    %c0_i32_2 = arith.constant 0 : i32
    return %c0_i32, %c0_i32_0, %c0_i32_1 : i32, i32, i32
  }
  func.func @transform_15(%arg0: i32) -> (i32, i32, i32) {
    %c0_i32 = arith.constant 0 : i32
    %c0_i32_0 = arith.constant 0 : i32
    %c0_i32_1 = arith.constant 0 : i32
    %c0_i32_2 = arith.constant 0 : i32
    return %c0_i32, %c0_i32_0, %c0_i32_1 : i32, i32, i32
  }
  func.func @transform_16(%arg0: i32) -> (i32, i32) {
    %c0_i32 = arith.constant 0 : i32
    %c0_i32_0 = arith.constant 0 : i32
    %c0_i32_1 = arith.constant 0 : i32
    return %c0_i32, %c0_i32_0 : i32, i32
  }
  func.func @transform_17(%arg0: i32) -> (i32, i32) {
    %c0_i32 = arith.constant 0 : i32
    %c0_i32_0 = arith.constant 0 : i32
    %c0_i32_1 = arith.constant 0 : i32
    return %c0_i32, %c0_i32_0 : i32, i32
  }
  func.func @transform_18(%arg0: i32) -> (i32, i32) {
    %c0_i32 = arith.constant 0 : i32
    %c0_i32_0 = arith.constant 0 : i32
    %c0_i32_1 = arith.constant 0 : i32
    return %c0_i32, %c0_i32_0 : i32, i32
  }
  func.func @transform_19(%arg0: i32) -> (i32, i32) {
    %c0_i32 = arith.constant 0 : i32
    %c0_i32_0 = arith.constant 0 : i32
    %c0_i32_1 = arith.constant 0 : i32
    return %c0_i32, %c0_i32_0 : i32, i32
  }
  func.func @transform_20(%arg0: i32) -> (i32, i32) {
    %c0_i32 = arith.constant 0 : i32
    %c0_i32_0 = arith.constant 0 : i32
    return %arg0, %c0_i32 : i32, i32
  }
}

</mosaic_0001>

<bundles_post_ra>
// kernel: tpu_custom_call.1
= control target key start
LH: loop header
LB: loop body
LE: loop exit
PB: predicated region body
PF: predicated region fallthrough
CT: control target
= control target key end

     0   :  { %s4368_s0 = inlined_call_operand.hbm [shape: bf16[4,640], index: 0, kind: input, shape index: {}]   ;;  %s4369_s1 = inlined_call_operand.hbm [shape: f32[4,128], index: 1, kind: input, shape index: {}]   ;;  %s4370_s2 = inlined_call_operand.hbm [shape: bf16[640,128], index: 2, kind: input, shape index: {}]   ;;  %s4371_s3 = inlined_call_operand.hbm [shape: f32[1,128], index: 3, kind: input, shape index: {}]   ;;  %s4372_s4 = inlined_call_operand.hbm [shape: bf16[3,128,384], index: 4, kind: input, shape index: {}]   ;;  %s4373_s5 = inlined_call_operand.vmem [shape: f32[3,1,384], index: 5, kind: input, shape index: {}]   ;;  %s4374_s6 = inlined_call_operand.hbm [shape: bf16[3,128,128], index: 6, kind: input, shape index: {}]   ;;  %s4375_s7 = inlined_call_operand.hbm [shape: f32[3,1,128], index: 7, kind: input, shape index: {}]   ;;  %s4376_s8 = inlined_call_operand.hbm [shape: f32[3,1,128], index: 8, kind: input, shape index: {}]   ;;  %s4377_s9 = inlined_call_operand.hbm [shape: f32[3,1,128], index: 9, kind: input, shape index: {}]   ;;  %s4378_s10 = inlined_call_operand.hbm [shape: bf16[3,128,256], index: 10, kind: input, shape index: {}]   ;;  %s4379_s11 = inlined_call_operand.vmem [shape: f32[3,1,256], index: 11, kind: input, shape index: {}]   ;;  %s4380_s12 = inlined_call_operand.hbm [shape: bf16[3,256,128], index: 12, kind: input, shape index: {}]   ;;  %s4381_s13 = inlined_call_operand.vmem [shape: f32[3,1,128], index: 13, kind: input, shape index: {}]   ;;  %s4382_s14 = inlined_call_operand.vmem [shape: f32[3,1,128], index: 14, kind: input, shape index: {}]   ;;  %s4383_s15 = inlined_call_operand.vmem [shape: f32[3,1,128], index: 15, kind: input, shape index: {}]   ;;  %s4384_s16 = inlined_call_operand.hbm [shape: bf16[128,128], index: 16, kind: input, shape index: {}]   ;;  %s4385_s17 = inlined_call_operand.vmem [shape: f32[1,128], index: 17, kind: input, shape index: {}]   ;;  %s4386_s18 = inlined_call_operand.hbm [shape: bf16[128,128], index: 18, kind: input, shape index: {}]   ;;  %s4387_s19 = inlined_call_operand.vmem [shape: f32[1,128], index: 19, kind: input, shape index: {}]   ;;  %s4388_s20 = inlined_call_operand.hbm [shape: bf16[4,128], index: 20, kind: output, shape index: {}]  }
   0x1   :  { %4389 = sst [smem:[#allocation32_spill]] %s4368_s0 }
   0x2   :  { %4390 = sst [smem:[#allocation33_spill]] %s4369_s1 }
   0x3   :  { %4391 = sst [smem:[#allocation34_spill]] %s4370_s2 }
   0x4   :  { %4392 = sst [smem:[#allocation35_spill]] %s4371_s3 }
   0x5   :  { %4393 = sst [smem:[#allocation36_spill]] %s4372_s4 }
   0x6   :  { %25 = vsyncpa [#allocation3], 0 }
   0x7   :  { %26 = vsyncpa [#allocation6], 0 }
   0x8   :  { %27 = vsyncpa [#allocation9], 0 }
   0x9   :  { %28 = vsyncpa [#allocation12], 0 }
   0xa   :  { %29 = vsyncpa [#allocation15], 0 }
   0xb   :  { %30 = vsyncpa [#allocation18], 0 }
   0xc   :  { %31 = vsyncpa [#allocation21], 0 }
   0xd   :  { %32 = vsyncpa [#allocation4], 0  ;;  %s3994_s1 = smov [#allocation5]   ;;  %s3995_s23 = smov [#allocation8]  }
   0xe   :  { %s49_s22 = sshll.u32 %s3994_s1, 4  ;;  %s71_s24 = sshll.u32 %s3995_s23, 4  ;;  %s50_s22 = int_to_ptr.vmem [resolvable:$true] %s49_s22  ;;  %s72_s24 = int_to_ptr.vmem [resolvable:$true] %s71_s24 }
   0xf   :  { %s3706_s2 = scalar_lea.vmem %s50_s22, 64  ;;  %p3711_p1 = scmp.lt.s32.totalorder %s50_s22, %s50_s22 }
  0x10   :  { %p3707_p0 = scmp.ne.s32.totalorder %s50_s22, %s3706_s2  ;;  %p3712_p2 = scmp.lt.s32.totalorder %s3706_s2, %s3706_s2 }
  0x12   :  { %p3713_p3 = por %p3712_p2, %p3711_p1 }
  0x14   :  { %p3714_p4 = pnand %p3713_p3, %p3707_p0 }
  0x16   :  { %3717 = shalt.err (!%p3714_p4)
}
  0x17   :  { %s4394_s26 = sld [smem:[#allocation33_spill]]  ;;  %s3726_s27 = scalar_lea.vmem %s72_s24, 16 }
  0x18   :  { %p3727_p5 = scmp.ne.s32.totalorder %s72_s24, %s3726_s27  ;;  %s3730_s28 = scalar_lea.vmem %s72_s24, 32 }
  0x19   :  { %p3731_p6 = scmp.lt.s32.totalorder %s72_s24, %s72_s24  ;;  %p3732_p7 = scmp.lt.s32.totalorder %s3730_s28, %s3726_s27 }
  0x1b   :  { %p3733_p8 = por %p3732_p7, %p3731_p6 }
  0x1d   :  { %52 = dma.hbm_to_vmem [thread:$0]  %s4394_s26, 64, %s50_s22, [#allocation6]  }
  0x1e   :  { %p3734_p9 = pnand %p3733_p8, %p3727_p5 }
  0x20   :  { %3737 = shalt.err (!%p3734_p9)
}
  0x21   :  { %s4395_s30 = sld [smem:[#allocation35_spill]]  ;;  %s3996_s0 = smov [#allocation11]  }
  0x22   :  { %s94_s21 = sshll.u32 %s3996_s0, 4  ;;  %s95_s21 = int_to_ptr.vmem [resolvable:$true] %s94_s21 }
  0x23   :  { %s3746_s1 = scalar_lea.vmem %s95_s21, 3072  ;;  %p3751_p11 = scmp.lt.s32.totalorder %s95_s21, %s95_s21 }
  0x24   :  { %p3747_p10 = scmp.ne.s32.totalorder %s95_s21, %s3746_s1  ;;  %p3752_p12 = scmp.lt.s32.totalorder %s3746_s1, %s3746_s1 }
  0x26   :  { %p3753_p13 = por %p3752_p12, %p3751_p11 }
  0x27   :  { %74 = dma.hbm_to_vmem [thread:$0]  %s4395_s30, 16, %s72_s24, [#allocation9]  }
  0x28   :  { %p3754_p0 = pnand %p3753_p13, %p3747_p10 }
  0x2a   :  { %3757 = shalt.err (!%p3754_p0)
}
  0x2b   :  { %s3997_s22 = smov 64   ;;  %s3998_s23 = smov 4  }
  0x2c   :  { %100 = dma.hbm_to_vmem [thread:$0]  %s4374_s6, 3072, %s95_s21, [#allocation12], %s3997_s22, %s3997_s22, %s3998_s23  }
  0x2d   :  { %s3999_s24 = smov [#allocation14]   ;;  %s4000_s26 = smov [#allocation17]  }
  0x2e   :  { %s118_s3 = sshll.u32 %s3999_s24, 4  ;;  %s142_s27 = sshll.u32 %s4000_s26, 4  ;;  %s119_s3 = int_to_ptr.vmem [resolvable:$true] %s118_s3  ;;  %s143_s27 = int_to_ptr.vmem [resolvable:$true] %s142_s27 }
  0x2f   :  { %s3766_s28 = scalar_lea.vmem %s119_s3, 48  ;;  %s3770_s4 = scalar_lea.vmem %s119_s3, 64 }
  0x30   :  { %p3767_p1 = scmp.ne.s32.totalorder %s119_s3, %s3766_s28  ;;  %p3771_p2 = scmp.lt.s32.totalorder %s119_s3, %s119_s3 }
  0x31   :  { %p3772_p3 = scmp.lt.s32.totalorder %s3770_s4, %s3766_s28 }
  0x33   :  { %p3773_p4 = por %p3772_p3, %p3771_p2 }
  0x35   :  { %p3774_p5 = pnand %p3773_p4, %p3767_p1 }
  0x37   :  { %3777 = shalt.err (!%p3774_p5)
}
  0x38   :  { %s4001_s29 = smov 16   ;;  %s4002_s30 = smov 1  }
  0x39   :  { %124 = dma.hbm_to_vmem [thread:$0]  %s4376_s8, 48, %s119_s3, [#allocation15], %s4001_s29, %s4001_s29, %s4002_s30  }
  0x3a   :  { %s3786_s21 = scalar_lea.vmem %s143_s27, 6144  ;;  %p3791_p7 = scmp.lt.s32.totalorder %s143_s27, %s143_s27 }
  0x3b   :  { %p3787_p6 = scmp.ne.s32.totalorder %s143_s27, %s3786_s21  ;;  %p3792_p8 = scmp.lt.s32.totalorder %s3786_s21, %s3786_s21 }
  0x3d   :  { %p3793_p9 = por %p3792_p8, %p3791_p7 }
  0x3f   :  { %p3794_p10 = pnand %p3793_p9, %p3787_p6 }
  0x41   :  { %3797 = shalt.err (!%p3794_p10)
}
  0x42   :  { %s4003_s1 = smov 128   ;;  %s4004_s2 = smov 8  }
  0x43   :  { %148 = dma.hbm_to_vmem [thread:$0]  %s4378_s10, 6144, %s143_s27, [#allocation18], %s4003_s1, %s4003_s1, %s4004_s2  }
  0x44   :  { %s4005_s26 = smov [#allocation20]   ;;  %s4006_s4 = smov [#allocation2]  }
  0x45   :  { %s174_s28 = sshll.u32 %s4005_s26, 4  ;;  %s39_s0 = sshll.u32 %s4006_s4, 4  ;;  %s175_s28 = int_to_ptr.vmem [resolvable:$true] %s174_s28  ;;  %s40_s0 = int_to_ptr.vmem [resolvable:$true] %s39_s0 }
  0x46   :  { %s3806_s8 = scalar_lea.vmem %s175_s28, 1024  ;;  %p3811_p12 = scmp.lt.s32.totalorder %s175_s28, %s175_s28 }
  0x47   :  { %p3807_p11 = scmp.ne.s32.totalorder %s175_s28, %s3806_s8  ;;  %p3812_p13 = scmp.lt.s32.totalorder %s3806_s8, %s3806_s8 }
  0x49   :  { %p3813_p0 = por %p3812_p13, %p3811_p12 }
  0x4b   :  { %p3814_p1 = pnand %p3813_p0, %p3807_p11 }
  0x4d   :  { %3817 = shalt.err (!%p3814_p1)
}
  0x4e   :  { %180 = dma.hbm_to_vmem [thread:$0]  %s4384_s16, 1024, %s175_s28, [#allocation21], %s3997_s22, %s3997_s22, %s3998_s23  }
  0x4f   :  { %s3826_s10 = scalar_lea.vmem %s40_s0, 160  ;;  %p3831_p3 = scmp.lt.s32.totalorder %s40_s0, %s40_s0 }
  0x50   :  { %p3827_p2 = scmp.ne.s32.totalorder %s40_s0, %s3826_s10  ;;  %p3832_p4 = scmp.lt.s32.totalorder %s3826_s10, %s3826_s10 }
  0x52   :  { %p3833_p5 = por %p3832_p4, %p3831_p3 }
  0x54   :  { %p3834_p6 = pnand %p3833_p5, %p3827_p2 }
  0x56   :  { %3837 = shalt.err (!%p3834_p6)
}
  0x57   :  { %s4396_s1 = sld [smem:[#allocation32_spill]]  ;;  %s4007_s2 = smov [#allocation7]  }
  0x58   :  { %s58_s25 = sshll.u32 %s4007_s2, 4  ;;  %s4008_s24 = smov [#allocation10]   ;;  %s59_s25 = int_to_ptr.vmem [resolvable:$true] %s58_s25 }
  0x59   :  { %s80_s26 = sshll.u32 %s4008_s24, 4  ;;  %s3846_s4 = scalar_lea.vmem %s59_s25, 5120  ;;  %s81_s26 = int_to_ptr.vmem [resolvable:$true] %s80_s26 }
  0x5a   :  { %p3847_p7 = scmp.ne.s32.totalorder %s59_s25, %s3846_s4  ;;  %p3851_p8 = scmp.lt.s32.totalorder %s59_s25, %s59_s25 }
  0x5b   :  { %p3852_p9 = scmp.lt.s32.totalorder %s3846_s4, %s3846_s4 }
  0x5d   :  { %42 = dma.hbm_to_vmem [thread:$0]  %s4396_s1, 160, %s40_s0, [#allocation3]  }
  0x5e   :  { %p3853_p10 = por %p3852_p9, %p3851_p8 }
  0x60   :  { %p3854_p11 = pnand %p3853_p10, %p3847_p7 }
  0x62   :  { %3857 = shalt.err (!%p3854_p11)
}
  0x63   :  { %s4397_s8 = sld [smem:[#allocation34_spill]]  ;;  %s3866_s0 = scalar_lea.vmem %s81_s26, 9216 }
  0x64   :  { %p3867_p12 = scmp.ne.s32.totalorder %s81_s26, %s3866_s0  ;;  %p3871_p13 = scmp.lt.s32.totalorder %s81_s26, %s81_s26 }
  0x65   :  { %p3872_p0 = scmp.lt.s32.totalorder %s3866_s0, %s3866_s0 }
  0x67   :  { %p3873_p1 = por %p3872_p0, %p3871_p13 }
  0x69   :  { %64 = dma.hbm_to_vmem [thread:$0]  %s4397_s8, 5120, %s59_s25, [#allocation6], %s3997_s22, %s3997_s22, %s3998_s23  }
  0x6a   :  { %p3874_p2 = pnand %p3873_p1, %p3867_p12 }
  0x6c   :  { %3877 = shalt.err (!%p3874_p2)
}
  0x6d   :  { %s4009_s3 = smov 192   ;;  %s4010_s6 = smov 12  }
  0x6e   :  { %s4398_s21 = sld [smem:[#allocation36_spill]]  ;;  %s4011_s1 = smov [#allocation13]  }
  0x6f   :  { %s106_s2 = sshll.u32 %s4011_s1, 4  ;;  %s4012_s24 = smov [#allocation16]   ;;  %s107_s2 = int_to_ptr.vmem [resolvable:$true] %s106_s2 }
  0x70   :  { %s130_s4 = sshll.u32 %s4012_s24, 4  ;;  %s3886_s25 = scalar_lea.vmem %s107_s2, 48  ;;  %s131_s4 = int_to_ptr.vmem [resolvable:$true] %s130_s4 }
  0x71   :  { %p3887_p3 = scmp.ne.s32.totalorder %s107_s2, %s3886_s25  ;;  %s3890_s16 = scalar_lea.vmem %s107_s2, 64 }
  0x72   :  { %p3891_p4 = scmp.lt.s32.totalorder %s107_s2, %s107_s2  ;;  %p3892_p5 = scmp.lt.s32.totalorder %s3890_s16, %s3886_s25 }
  0x74   :  { %86 = dma.hbm_to_vmem [thread:$0]  %s4398_s21, 9216, %s81_s26, [#allocation9], %s4009_s3, %s4009_s3, %s4010_s6  }
  0x75   :  { %p3893_p6 = por %p3892_p5, %p3891_p4 }
  0x77   :  { %p3894_p7 = pnand %p3893_p6, %p3887_p3 }
  0x79   :  { %3897 = shalt.err (!%p3894_p7)
}
  0x7a   :  { %112 = dma.hbm_to_vmem [thread:$0]  %s4375_s7, 48, %s107_s2, [#allocation12], %s4001_s29, %s4001_s29, %s4002_s30  }
  0x7b   :  { %s3906_s26 = scalar_lea.vmem %s131_s4, 48  ;;  %s3910_s0 = scalar_lea.vmem %s131_s4, 64 }
  0x7c   :  { %p3907_p8 = scmp.ne.s32.totalorder %s131_s4, %s3906_s26  ;;  %p3911_p9 = scmp.lt.s32.totalorder %s131_s4, %s131_s4 }
  0x7d   :  { %p3912_p10 = scmp.lt.s32.totalorder %s3910_s0, %s3906_s26 }
  0x7f   :  { %p3913_p11 = por %p3912_p10, %p3911_p9 }
  0x81   :  { %p3914_p12 = pnand %p3913_p11, %p3907_p8 }
  0x83   :  { %3917 = shalt.err (!%p3914_p12)
}
  0x84   :  { %136 = dma.hbm_to_vmem [thread:$0]  %s4377_s9, 48, %s131_s4, [#allocation15], %s4001_s29, %s4001_s29, %s4002_s30  }
  0x85   :  { %s4013_s10 = smov [#allocation19]   ;;  %s4014_s7 = smov [#allocation22]  }
  0x86   :  { %s156_s27 = sshll.u32 %s4013_s10, 4  ;;  %s188_s21 = sshll.u32 %s4014_s7, 4  ;;  %s157_s27 = int_to_ptr.vmem [resolvable:$true] %s156_s27  ;;  %s189_s21 = int_to_ptr.vmem [resolvable:$true] %s188_s21 }
  0x87   :  { %s3926_s1 = scalar_lea.vmem %s157_s27, 6144  ;;  %p3931_p0 = scmp.lt.s32.totalorder %s157_s27, %s157_s27 }
  0x88   :  { %p3927_p13 = scmp.ne.s32.totalorder %s157_s27, %s3926_s1  ;;  %p3932_p1 = scmp.lt.s32.totalorder %s3926_s1, %s3926_s1 }
  0x8a   :  { %p3933_p2 = por %p3932_p1, %p3931_p0 }
  0x8c   :  { %p3934_p3 = pnand %p3933_p2, %p3927_p13 }
  0x8e   :  { %3937 = shalt.err (!%p3934_p3)
}
  0x8f   :  { %162 = dma.hbm_to_vmem [thread:$0]  %s4380_s12, 6144, %s157_s27, [#allocation18], %s3997_s22, %s3997_s22, %s3998_s23  }
  0x90   :  { %s3946_s9 = scalar_lea.vmem %s189_s21, 1024  ;;  %p3951_p5 = scmp.lt.s32.totalorder %s189_s21, %s189_s21 }
  0x91   :  { %p3947_p4 = scmp.ne.s32.totalorder %s189_s21, %s3946_s9  ;;  %p3952_p6 = scmp.lt.s32.totalorder %s3946_s9, %s3946_s9 }
  0x93   :  { %p3953_p7 = por %p3952_p6, %p3951_p5 }
  0x95   :  { %p3954_p8 = pnand %p3953_p7, %p3947_p4 }
  0x97   :  { %3957 = shalt.err (!%p3954_p8)
}
  0x98   :  { %194 = dma.hbm_to_vmem [thread:$0]  %s4386_s18, 1024, %s189_s21, [#allocation21], %s3997_s22, %s3997_s22, %s3998_s23  }
  0x99   :  { %3978 = dma.done.wait [#allocation3], 160  }
  0x9a   :  { %3979 = vsyncadd [#allocation3], 4294967136 }
  0x9b   :  { %3980 = dma.done.wait [#allocation6], 5184  }
  0x9c   :  { %3981 = vsyncadd [#allocation6], 4294962112 }
  0x9d   :  { %3982 = dma.done.wait [#allocation9], 9232  }
  0x9e   :  { %3983 = vsyncadd [#allocation9], 4294958064 }
  0x9f   :  { %3984 = dma.done.wait [#allocation12], 3120  }
  0xa0   :  { %3985 = vsyncadd [#allocation12], 4294964176 }
  0xa1   :  { %3986 = dma.done.wait [#allocation15], 96  }
  0xa2   :  { %3987 = vsyncadd [#allocation15], 4294967200 }
  0xa3   :  { %3988 = dma.done.wait [#allocation18], 12288  }
  0xa4   :  { %3989 = vsyncadd [#allocation18], 4294955008 }
  0xa5   :  { %3990 = dma.done.wait [#allocation21], 2048  }
  0xa6   :  { %3991 = vsyncadd [#allocation21], 4294965248  ;;  %v3461_v0 = vld [vmem:[#allocation7 + $0x78] sm:$0xff]   ;;  %v3465_v4 = vld [vmem:[#allocation7 + $0x70] sm:$0xff]   ;;  %v4015_v21 = vmov 1983009808   ;;  %v332_v23 = vlaneseq }
  0xa7   :  { %v3462_v1 = vld [vmem:[#allocation7 + $0x38] sm:$0xff]   ;;  %3064 = vmatprep.subr.bf16.mxu0 %v3461_v0  ;;  %v3466_v5 = vld [vmem:[#allocation7 + $0x30] sm:$0xff]   ;;  %v3469_v8 = vld [vmem:[#allocation7 + $0x68] sm:$0xff]   ;;  %v330_v22 = vunpack.c.l.s4 %v4015_v21  ;;  %v4016_v40 = vmov 0.0   ;;  %vm4017_vm0 = vmmov 0   ;;  %vm946_vm1 = vcmask 1043456  }
  0xa8   :  { %v3463_v2 = vld [vmem:[#allocation7 + $0xf8] sm:$0xff]   ;;  %3065 = vmatpush3.bf16.msra.mxu0 %v3462_v1  ;;  %v3467_v6 = vld [vmem:[#allocation7 + $0xf0] sm:$0xff]   ;;  %v3470_v9 = vld [vmem:[#allocation7 + $0x28] sm:$0xff]   ;;  %v4188_v29 = vshrl.u32 %v332_v23, 7  ;;  %s4019_s16 = smov [#allocation23]  }
  0xa9   :  { %v3464_v3 = vld [vmem:[#allocation7 + $0xb8] sm:$0xff]   ;;  %3086 = vmatprep.subr.bf16.mxu1 %v3463_v2  ;;  %3066 = vmatprep.subr.bf16.mxu0 %v3465_v4  ;;  %v3468_v7 = vld [vmem:[#allocation7 + $0xb0] sm:$0xff]   ;;  %v3471_v10 = vld [vmem:[#allocation7 + $0xe8] sm:$0xff]   ;;  %v331_v28 = vunpack.c.0.s8 %v330_v22  ;;  %s2817_s28 = sshll.u32 %s4019_s16, 4  ;;  %s2818_s28 = int_to_ptr.vmem [resolvable:$true] %s2817_s28 }
  0xaa   :  { %3087 = vmatpush3.bf16.msra.mxu1 %v3464_v3  ;;  %v3472_v11 = vld [vmem:[#allocation7 + $0xa8] sm:$0xff]   ;;  %v3473_v12 = vld [vmem:[#allocation7 + $0x60] sm:$0xff]   ;;  %v3477_v16 = vld [vmem:[#allocation7 + $0x58] sm:$0xff]   ;;  %p3963_p10 = scmp.lt.s32.totalorder %s2818_s28, %s2818_s28 }
  0xab   :  { %3088 = vmatprep.subr.bf16.mxu1 %v3467_v6  ;;  %v3474_v13 = vld [vmem:[#allocation7 + $0x20] sm:$0xff]   ;;  %v3478_v17 = vld [vmem:[#allocation7 + $0x18] sm:$0xff]   ;;  %v3481_v20 = vld [vmem:[#allocation7 + $0x50] sm:$0xff]   ;;  %v334_v34 = vsub.s32 %v331_v28, %v4188_v29 }
  0xac   :  { %3067 = vmatpush3.bf16.msra.mxu0 %v3466_v5  ;;  %v3475_v14 = vld [vmem:[#allocation7 + $0xe0] sm:$0xff]   ;;  %v3479_v18 = vld [vmem:[#allocation7 + $0xd8] sm:$0xff]   ;;  %v3482_v24 = vld [vmem:[#allocation7 + $0x10] sm:$0xff]  }
  0xad   :  { %3068 = vmatprep.subr.bf16.mxu0 %v3469_v8  ;;  %v3476_v15 = vld [vmem:[#allocation7 + $0xa0] sm:$0xff]   ;;  %v3480_v19 = vld [vmem:[#allocation7 + $0x98] sm:$0xff]   ;;  %v3483_v25 = vld [vmem:[#allocation7 + $0xd0] sm:$0xff]  }
  0xae   :  { %3089 = vmatpush3.bf16.msra.mxu1 %v3468_v7  ;;  %v3484_v26 = vld [vmem:[#allocation7 + $0x90] sm:$0xff]   ;;  %v3485_v27 = vld [vmem:[#allocation7 + $0x48] sm:$0xff]   ;;  %v3489_v33 = vld [vmem:[#allocation7 + $0x40] sm:$0xff]  }
  0xaf   :  { %3090 = vmatprep.subr.bf16.mxu1 %v3471_v10  ;;  %v3486_v30 = vld [vmem:[#allocation7 + $0x8] sm:$0xff]   ;;  %v3490_v35 = vld [vmem:[#allocation7] sm:$0xff]   ;;  %v237_v37 = vld [vmem:[#allocation2] sm:$0xff] }
  0xb0   :  { %3069 = vmatpush3.bf16.msra.mxu0 %v3470_v9  ;;  %v3487_v31 = vld [vmem:[#allocation7 + $0xc8] sm:$0xff]   ;;  %v3491_v36 = vld [vmem:[#allocation7 + $0xc0] sm:$0xff]   ;;  %v335_v38 = vrot.slane %v237_v37, %v334_v34  ;;  %v328_v41 = vcombine.high %v237_v37, %v237_v37  ;;  %v3494_v44 = vld [vmem:[#allocation7 + $0x138] sm:$0xff]  }
  0xb1   :  { %3070 = vmatprep.subr.bf16.mxu0 %v3473_v12  ;;  %v3488_v32 = vld [vmem:[#allocation7 + $0x88] sm:$0xff]   ;;  %v3492_v39 = vld [vmem:[#allocation7 + $0x80] sm:$0xff]   ;;  %v3495_v46 = vld [vmem:[#allocation7 + $0x130] sm:$0xff]  }
  0xb2   :  { %3091 = vmatpush3.bf16.msra.mxu1 %v3472_v11  ;;  %v343_v42 = vcombine.high %v335_v38, %v335_v38  ;;  %v342_v43 = vrot.slane %v328_v41, %v334_v34  ;;  %v3496_v47 = vld [vmem:[#allocation7 + $0x128] sm:$0xff]   ;;  %v3497_v48 = vld [vmem:[#allocation7 + $0x120] sm:$0xff]   ;;  %v3498_v49 = vld [vmem:[#allocation7 + $0x118] sm:$0xff]  }
  0xb3   :  { %3092 = vmatprep.subr.bf16.mxu1 %v3475_v14  ;;  %v3499_v50 = vld [vmem:[#allocation7 + $0x110] sm:$0xff]   ;;  %v3500_v51 = vld [vmem:[#allocation7 + $0x108] sm:$0xff]   ;;  %v3501_v52 = vld [vmem:[#allocation7 + $0x100] sm:$0xff]  }
  0xb4   :  { %3071 = vmatpush3.bf16.msra.mxu0 %v3474_v13  ;;  %629 = vmatprep.mubr.bf16.mxu0 %v343_v42  ;;  %v344_v45 = vcombine.high %v342_v43, %v342_v43  ;;  %v2833_v53 = vld.sshfl [vmem:[#allocation2 + $0x8] sm:$0x3 pattern:$0x76325410]  ;;  %v3502_v54 = vld [vmem:[#allocation10 + $0xb0] ss:$12 sps:$4 sm:$0xff]  }
  0xb5   :  { %3072 = vmatprep.subr.bf16.mxu0 %v3477_v16  ;;  %v3503_v55 = vld [vmem:[#allocation10 + $0x98] ss:$12 sps:$4 sm:$0xff]   ;;  %v3504_v56 = vld [vmem:[#allocation10 + $0x80] ss:$12 sps:$4 sm:$0xff]   ;;  %v3505_v57 = vld [vmem:[#allocation10 + $0x68] ss:$12 sps:$4 sm:$0xff]  }
  0xb6   :  { %3093 = vmatpush3.bf16.msra.mxu1 %v3476_v15  ;;  %669 = vmatprep.mubr.bf16.mxu1 %v344_v45  ;;  %v3506_v58 = vld [vmem:[#allocation10 + $0x50] ss:$12 sps:$4 sm:$0xff]   ;;  %v3507_v59 = vld [vmem:[#allocation10 + $0x38] ss:$12 sps:$4 sm:$0xff]   ;;  %v3508_v60 = vld [vmem:[#allocation10 + $0x20] ss:$12 sps:$4 sm:$0xff]  }
  0xb7   :  { %3094 = vmatprep.subr.bf16.mxu1 %v3479_v18  ;;  %v3509_v61 = vld [vmem:[#allocation10 + $0x8] ss:$12 sps:$4 sm:$0xff]   ;;  %v3510_v62 = vld [vmem:[#allocation11 + $0x38] sm:$0xff]   ;;  %v3513_v1 = vld [vmem:[#allocation11 + $0x20] sm:$0xff]  }
  0xb8   :  { %3073 = vmatpush3.bf16.msra.mxu0 %v3478_v17  ;;  %v3511_v63 = vld [vmem:[#allocation11 + $0x30] sm:$0xff]   ;;  %v3512_v0 = vld [vmem:[#allocation11 + $0x28] sm:$0xff]   ;;  %v3514_v2 = vld [vmem:[#allocation11 + $0x18] sm:$0xff]  }
  0xb9   :  { %3074 = vmatprep.subr.bf16.mxu0 %v3481_v20  ;;  %v3515_v3 = vld [vmem:[#allocation11 + $0x10] sm:$0xff]   ;;  %v3516_v4 = vld [vmem:[#allocation11 + $0x8] sm:$0xff]   ;;  %v2832_v14 = vld [vmem:[#allocation8] ss:$0 sm:$0xff] }
  0xba   :  { %3095 = vmatpush3.bf16.msra.mxu1 %v3480_v19  ;;  %v717_v19 = vld [vmem:[#allocation5] sm:$0xf]  ;;  %v736_v28 = vld [vmem:[%s4373_s5] sm:$0x7]  ;;  %v2882_v37 = vld [vmem:[#allocation13] ss:$0 sm:$0xff] }
  0xbb   :  { %3096 = vmatprep.subr.bf16.mxu1 %v3483_v25 }
  0xbc   :  { %3075 = vmatpush3.bf16.msra.mxu0 %v3482_v24 }
  0xbd   :  { %3076 = vmatprep.subr.bf16.mxu0 %v3485_v27  ;;  %v4222_v27 = vsub.s32 2, %v4188_v29 }
  0xbe   :  { %3097 = vmatpush3.bf16.msra.mxu1 %v3484_v26  ;;  %v3517_v26 = vld [vmem:[#allocation11] sm:$0xff]  }
  0xbf   :  { %3098 = vmatprep.subr.bf16.mxu1 %v3487_v31 }
  0xc0   :  { %3077 = vmatpush3.bf16.msra.mxu0 %v3486_v30  ;;  %v741_v30 = vrot.slane %v736_v28, %v4222_v27  ;;  %v3555_v28 = vld [vmem:[#allocation19 + $0x8] sm:$0xff]  }
  0xc1   :  { %3078 = vmatprep.subr.bf16.mxu0 %v3489_v33 }
  0xc2   :  { %3099 = vmatpush3.bf16.msra.mxu1 %v3488_v32 }
  0xc3   :  { %3100 = vmatprep.subr.bf16.mxu1 %v3491_v36 }
  0xc4   :  { %3079 = vmatpush3.bf16.msra.mxu0 %v3490_v35 }
  0xc5   :  { %3255 = vmatprep.subr.bf16.mxu0 %v4016_v40 }
  0xc6   :  { %3101 = vmatpush3.bf16.msra.mxu1 %v3492_v39 }
  0xc7   :  { %3275 = vmatprep.subr.bf16.mxu1 %v4016_v40  ;;  %630 = vmatmul.mubr.bf16.vlgmr.msra.gmra.mxu0 %v335_v38 }
  0xc8   :  { %3256 = vmatpush3.bf16.msra.mxu0 %v3494_v44  ;;  %3271 = vmatprep.mubr.msk.bf16.mxu0 %vm4017_vm0, %v4016_v40 }
  0xc9   :  { %670 = vmatmul.mubr.bf16.vlgmr.msra.gmra.mxu1 %v342_v43  ;;  %3257 = vmatprep.subr.bf16.mxu0 %v4016_v40 }
  0xca   :  { %3291 = vmatprep.mubr.msk.bf16.mxu1 %vm4017_vm0, %v4016_v40  ;;  %3276 = vmatpush3.bf16.msra.mxu1 %v3502_v54 }
  0xcb   :  { %3277 = vmatprep.subr.bf16.mxu1 %v4016_v40 }
  0xcc   :  { %3258 = vmatpush3.bf16.msra.mxu0 %v3495_v46  ;;  %v3518_v46 = vld [vmem:[#allocation17 + $0x70] ss:$8 sps:$4 sm:$0xff]  }
  0xcd   :  { %3259 = vmatprep.subr.bf16.mxu0 %v4016_v40 }
  0xce   :  { %3278 = vmatpush3.bf16.msra.mxu1 %v3503_v55  ;;  %v3526_v55 = vld [vmem:[#allocation17 + $0x54] ss:$8 sps:$4 sm:$0xff]  }
  0xcf   :  { %3279 = vmatprep.subr.bf16.mxu1 %v4016_v40 }
  0xd0   :  { %3260 = vmatpush3.bf16.msra.mxu0 %v3496_v47  ;;  %v3520_v47 = vld [vmem:[#allocation17 + $0x74] ss:$8 sps:$4 sm:$0xff]  }
  0xd1   :  { %3261 = vmatprep.subr.bf16.mxu0 %v4016_v40 }
  0xd2   :  { %3280 = vmatpush3.bf16.msra.mxu1 %v3504_v56  ;;  %v3524_v56 = vld [vmem:[#allocation17 + $0x50] ss:$8 sps:$4 sm:$0xff]  }
  0xd3   :  { %3281 = vmatprep.subr.bf16.mxu1 %v4016_v40 }
  0xd4   :  { %3262 = vmatpush3.bf16.msra.mxu0 %v3497_v48  ;;  %v3523_v48 = vld [vmem:[#allocation17 + $0x64] ss:$8 sps:$4 sm:$0xff]  }
  0xd5   :  { %3263 = vmatprep.subr.bf16.mxu0 %v4016_v40 }
  0xd6   :  { %3282 = vmatpush3.bf16.msra.mxu1 %v3505_v57  ;;  %v3527_v57 = vld [vmem:[#allocation17 + $0x40] ss:$8 sps:$4 sm:$0xff]  }
  0xd7   :  { %3283 = vmatprep.subr.bf16.mxu1 %v4016_v40 }
  0xd8   :  { %3264 = vmatpush3.bf16.msra.mxu0 %v3498_v49  ;;  %v3521_v49 = vld [vmem:[#allocation17 + $0x60] ss:$8 sps:$4 sm:$0xff]  }
  0xd9   :  { %3265 = vmatprep.subr.bf16.mxu0 %v4016_v40 }
  0xda   :  { %3284 = vmatpush3.bf16.msra.mxu1 %v3506_v58  ;;  %v3529_v58 = vld [vmem:[#allocation17 + $0x44] ss:$8 sps:$4 sm:$0xff]  }
  0xdb   :  { %3285 = vmatprep.subr.bf16.mxu1 %v4016_v40 }
  0xdc   :  { %3266 = vmatpush3.bf16.msra.mxu0 %v3499_v50 }
  0xdd   :  { %3267 = vmatprep.subr.bf16.mxu0 %v4016_v40 }
  0xde   :  { %3286 = vmatpush3.bf16.msra.mxu1 %v3507_v59  ;;  %v3532_v59 = vld [vmem:[#allocation17 + $0x34] ss:$8 sps:$4 sm:$0xff]  }
  0xdf   :  { %3287 = vmatprep.subr.bf16.mxu1 %v4016_v40 }
  0xe0   :  { %3268 = vmatpush3.bf16.msra.mxu0 %v3500_v51 }
  0xe1   :  { %3269 = vmatprep.subr.bf16.mxu0 %v4016_v40 }
  0xe2   :  { %3288 = vmatpush3.bf16.msra.mxu1 %v3508_v60  ;;  %v3530_v60 = vld [vmem:[#allocation17 + $0x30] ss:$8 sps:$4 sm:$0xff]  }
  0xe3   :  { %3289 = vmatprep.subr.bf16.mxu1 %v4016_v40 }
  0xe4   :  { %3270 = vmatpush3.bf16.msra.mxu0 %v3501_v52 }
  0xe5   :  { %3295 = vmatprep.subr.bf16.mxu0 %v4016_v40 }
  0xe6   :  { %3290 = vmatpush3.bf16.msra.mxu1 %v3509_v61  ;;  %v3535_v61 = vld [vmem:[#allocation17 + $0x24] ss:$8 sps:$4 sm:$0xff]  }
  0xe7   :  { %3272 = vmatmul.mubr.bf16.vlgmr.msra.gmra.mxu0 %v2833_v53  ;;  %1084 = vmatprep.subr.bf16.mxu1 %v3520_v47 }
  0xe8   :  { %3311 = vmatprep.mubr.msk.bf16.mxu0 %vm4017_vm0, %v4016_v40  ;;  %3296 = vmatpush3.bf16.msra.mxu0 %v3510_v62  ;;  %v4018_v62 = vmov 0  }
  0xe9   :  { %3297 = vmatprep.subr.bf16.mxu0 %v4016_v40 }
  0xec   :  { %3298 = vmatpush3.bf16.msra.mxu0 %v3511_v63  ;;  %v3533_v63 = vld [vmem:[#allocation17 + $0x20] ss:$8 sps:$4 sm:$0xff]  }
  0xed   :  { %3299 = vmatprep.subr.bf16.mxu0 %v4016_v40 }
  0xf0   :  { %3300 = vmatpush3.bf16.msra.mxu0 %v3512_v0  ;;  %v3538_v0 = vld [vmem:[#allocation17 + $0x14] ss:$8 sps:$4 sm:$0xff]  }
  0xf1   :  { %3301 = vmatprep.subr.bf16.mxu0 %v4016_v40 }
  0xf4   :  { %3302 = vmatpush3.bf16.msra.mxu0 %v3513_v1  ;;  %v3536_v1 = vld [vmem:[#allocation17 + $0x10] ss:$8 sps:$4 sm:$0xff]  }
  0xf5   :  { %3303 = vmatprep.subr.bf16.mxu0 %v4016_v40 }
  0xf8   :  { %3304 = vmatpush3.bf16.msra.mxu0 %v3514_v2  ;;  %v3541_v2 = vld [vmem:[#allocation17 + $0x4] ss:$8 sps:$4 sm:$0xff]  }
  0xf9   :  { %3305 = vmatprep.subr.bf16.mxu0 %v4016_v40 }
  0xfc   :  { %3306 = vmatpush3.bf16.msra.mxu0 %v3515_v3  ;;  %v3539_v3 = vld [vmem:[#allocation17] ss:$8 sps:$4 sm:$0xff]  }
  0xfd   :  { %3307 = vmatprep.subr.bf16.mxu0 %v4016_v40 }
 0x100   :  { %3308 = vmatpush3.bf16.msra.mxu0 %v3516_v4  ;;  %v3542_v4 = vld [vmem:[#allocation19 + $0x78] sm:$0xff]  }
 0x101   :  { %3309 = vmatprep.subr.bf16.mxu0 %v4016_v40 }
 0x104   :  { %3310 = vmatpush3.bf16.msra.mxu0 %v3517_v26  ;;  %v3554_v26 = vld [vmem:[#allocation19 + $0x48] sm:$0xff]  }
 0x105   :  { %3135 = vmatprep.subr.bf16.mxu0 %v3542_v4  ;;  %v3564_v4 = vld [vmem:[#allocation10 + $0xe0] ss:$12 sps:$4 sm:$0xff]  }
 0x187   :  { %v3080_v5 = vpop.f32.mrf.mxu0 }
 0x189   :  { %v3081_v6 = vpop.f32.mrf.mxu0  ;;  %v3102_v7 = vpop.f32.mrf.mxu1 }
 0x18a   :  { %v3082_v13 = vadd.f32 %v3081_v6, %v3080_v5  ;;  %v3543_v5 = vld [vmem:[#allocation19 + $0x38] sm:$0xff]   ;;  %v3544_v6 = vld [vmem:[#allocation19 + $0x70] sm:$0xff]  }
 0x18b   :  { %v3083_v8 = vpop.f32.mrf.mxu0  ;;  %v3103_v9 = vpop.f32.mrf.mxu1 }
 0x18c   :  { %v632_v15 = vadd.f32 %v3082_v13, %v2832_v14  ;;  %v3104_v16 = vadd.f32 %v3103_v9, %v3102_v7  ;;  %v3545_v7 = vld [vmem:[#allocation19 + $0x30] sm:$0xff]   ;;  %v3546_v8 = vld [vmem:[#allocation19 + $0x68] sm:$0xff]   ;;  %v3551_v13 = vld [vmem:[#allocation19 + $0x18] sm:$0xff]  }
 0x18d   :  { %v3084_v10 = vpop.f32.mrf.mxu0  ;;  %v3105_v11 = vpop.f32.mrf.mxu1  ;;  %v3547_v9 = vld [vmem:[#allocation19 + $0x28] sm:$0xff]   ;;  %v3552_v14 = vld [vmem:[#allocation19 + $0x50] sm:$0xff]  }
 0x18e   :  { %v672_v17 = vadd.f32 %v3104_v16, %v632_v15  ;;  %v3548_v10 = vld [vmem:[#allocation19 + $0x60] sm:$0xff]   ;;  %v3553_v15 = vld [vmem:[#allocation19 + $0x10] sm:$0xff]  }
 0x18f   :  { %v3106_v12 = vpop.f32.mrf.mxu1  ;;  %v3549_v11 = vld [vmem:[#allocation19 + $0x20] sm:$0xff]  }
 0x190   :  { %v3550_v12 = vld [vmem:[#allocation19 + $0x58] sm:$0xff]  }
 0x1a7   :  { %v711_v18 = vpop.f32.mrf.mxu0 }
 0x1a8   :  { %v712_v20 = vadd.f32 %v711_v18, %v672_v17 }
 0x1a9   :  { %v3273_v21 = vpop.f32.mrf.mxu0 }
 0x1aa   :  { %v718_v22 = vadd.f32 %v717_v19, %v712_v20  ;;  %v2891_v20 = vld [vmem:[#allocation14] ss:$0 sm:$0xff] }
 0x1ab   :  { %v714_v23 = vpop.f32.mrf.mxu0 }
 0x1ac   :  { %v719_v24 = vpack.c.bf16 %v718_v22, %v718_v22 }
 0x1ad   :  { %v3274_v25 = vpop.f32.mrf.mxu0 }
 0x1ae   :  { %3292 = vmatmul.mubr.bf16.vlgmr.msra.gmra.mxu1 %v719_v24 }
 0x1af   :  { %1085 = vmatpush1.bf16.msra.mxu1 %v3518_v46  ;;  %1116 = vmatprep.mubr.bf16.mxu1 %v4018_v62 }
 0x1b0   :  { %1086 = vmatprep.subr.bf16.mxu1 %v3523_v48  ;;  %v2909_v48 = vld [vmem:[%s4381_s13] ss:$0 sm:$0xff] }
 0x1b3   :  { %1087 = vmatpush1.bf16.msra.mxu1 %v3521_v49 }
 0x1b4   :  { %1088 = vmatprep.subr.bf16.mxu1 %v3526_v55 }
 0x1b7   :  { %1089 = vmatpush1.bf16.msra.mxu1 %v3524_v56  ;;  %v3558_v56 = vld [vmem:[#allocation10 + $0x170] ss:$12 sps:$4 sm:$0xff]  }
 0x1b8   :  { %1090 = vmatprep.subr.bf16.mxu1 %v3529_v58 }
 0x1bb   :  { %1091 = vmatpush1.bf16.msra.mxu1 %v3527_v57  ;;  %v3559_v57 = vld [vmem:[#allocation10 + $0x158] ss:$12 sps:$4 sm:$0xff]  }
 0x1bc   :  { %1092 = vmatprep.subr.bf16.mxu1 %v3532_v59 }
 0x1bf   :  { %1093 = vmatpush1.bf16.msra.mxu1 %v3530_v60 }
 0x1c0   :  { %1094 = vmatprep.subr.bf16.mxu1 %v3535_v61 }
 0x1c3   :  { %1095 = vmatpush1.bf16.msra.mxu1 %v3533_v63 }
 0x1c4   :  { %1096 = vmatprep.subr.bf16.mxu1 %v3538_v0  ;;  %v3560_v0 = vld [vmem:[#allocation10 + $0x140] ss:$12 sps:$4 sm:$0xff]  }
 0x1c7   :  { %1097 = vmatpush1.bf16.msra.mxu1 %v3536_v1  ;;  %v3561_v1 = vld [vmem:[#allocation10 + $0x128] ss:$12 sps:$4 sm:$0xff]  }
 0x1c8   :  { %1098 = vmatprep.subr.bf16.mxu1 %v3541_v2  ;;  %v3562_v2 = vld [vmem:[#allocation10 + $0x110] ss:$12 sps:$4 sm:$0xff]  }
 0x1cb   :  { %1099 = vmatpush1.bf16.msra.mxu1 %v3539_v3  ;;  %v3563_v3 = vld [vmem:[#allocation10 + $0xf8] ss:$12 sps:$4 sm:$0xff]  }
 0x1cc   :  { %3315 = vmatprep.subr.bf16.mxu1 %v4016_v40 }
 0x26e   :  { %v825_v31 = vpop.f32.mrf.mxu1 }
 0x26f   :  { %v826_v32 = vadd.f32 %v825_v31, %v741_v30  ;;  %v3556_v30 = vld [vmem:[#allocation19 + $0x40] sm:$0xff]  }
 0x270   :  { %v3293_v33 = vpop.f32.mrf.mxu1  ;;  %v3557_v31 = vld [vmem:[#allocation19] sm:$0xff]  }
 0x271   :  { %v831_v34 = vpack.c.bf16 %v826_v32, %v826_v32  ;;  %v4236_v32 = vsub.s32 0, %v4188_v29  ;;  %v992_v33 = vld [vmem:[%s4379_s11] sm:$0x3] }
 0x272   :  { %v828_v35 = vpop.f32.mrf.mxu1 }
 0x273   :  { %3312 = vmatmul.mubr.bf16.vlgmr.msra.gmra.mxu0 %v831_v34  ;;  %v4242_v34 = vsub.s32 1, %v4188_v29  ;;  %v997_v35 = vrot.slane %v992_v33, %v4236_v32 }
 0x274   :  { %v3294_v36 = vpop.f32.mrf.mxu1  ;;  %3136 = vmatpush3.bf16.msra.mxu0 %v3543_v5  ;;  %v3565_v5 = vld [vmem:[#allocation10 + $0xc8] ss:$12 sps:$4 sm:$0xff]  }
 0x275   :  { %3137 = vmatprep.subr.bf16.mxu0 %v3544_v6  ;;  %v1001_v36 = vrot.slane %v992_v33, %v4242_v34  ;;  %v3566_v6 = vld [vmem:[#allocation11 + $0x78] sm:$0xff]  }
 0x278   :  { %3138 = vmatpush3.bf16.msra.mxu0 %v3545_v7  ;;  %v3567_v7 = vld [vmem:[#allocation11 + $0x70] sm:$0xff]  }
 0x279   :  { %3139 = vmatprep.subr.bf16.mxu0 %v3546_v8  ;;  %v3568_v8 = vld [vmem:[#allocation11 + $0x68] sm:$0xff]  }
 0x27c   :  { %3140 = vmatpush3.bf16.msra.mxu0 %v3547_v9  ;;  %v3569_v9 = vld [vmem:[#allocation11 + $0x60] sm:$0xff]  }
 0x27d   :  { %3141 = vmatprep.subr.bf16.mxu0 %v3548_v10  ;;  %v3570_v10 = vld [vmem:[#allocation11 + $0x58] sm:$0xff]  }
 0x280   :  { %3142 = vmatpush3.bf16.msra.mxu0 %v3549_v11  ;;  %v3571_v11 = vld [vmem:[#allocation11 + $0x50] sm:$0xff]  }
 0x281   :  { %3143 = vmatprep.subr.bf16.mxu0 %v3550_v12  ;;  %v3572_v12 = vld [vmem:[#allocation11 + $0x48] sm:$0xff]  }
 0x284   :  { %3144 = vmatpush3.bf16.msra.mxu0 %v3551_v13 }
 0x285   :  { %3145 = vmatprep.subr.bf16.mxu0 %v3552_v14 }
 0x288   :  { %3146 = vmatpush3.bf16.msra.mxu0 %v3553_v15 }
 0x289   :  { %3147 = vmatprep.subr.bf16.mxu0 %v3554_v26 }
 0x28c   :  { %3148 = vmatpush3.bf16.msra.mxu0 %v3555_v28 }
 0x28d   :  { %3149 = vmatprep.subr.bf16.mxu0 %v3556_v30 }
 0x290   :  { %3150 = vmatpush3.bf16.msra.mxu0 %v3557_v31 }
 0x291   :  { %3335 = vmatprep.subr.bf16.mxu0 %v4016_v40 }
 0x333   :  { %v937_v38 = vpop.f32.mrf.mxu0 }
 0x334   :  { %v938_v39 = vadd.f32 %v2882_v37, %v937_v38 }
 0x335   :  { %v3313_v41 = vpop.f32.mrf.mxu0 }
 0x336   :  { %v943_v42 = vadd.f32 %v938_v39, %v718_v22  ;;  %v2892_v22 = vld [vmem:[#allocation16] ss:$0 sm:$0xff] }
 0x337   :  { %v940_v43 = vpop.f32.mrf.mxu0 }
 0x338   :  { %v947_v44 = vsel %vm946_vm1, %v943_v42, 0.0 }
 0x339   :  { %948 = vadd.xlane.f32.xlu0 %v947_v44  ;;  %v3314_v45 = vpop.f32.mrf.mxu0 }
 0x3c2   :  { %v949_v50 = vpop.xlane.xlu0 %948 }
 0x3c3   :  { %v951_v51 = vmul.f32 0.0078125, %v949_v50 }
 0x3c5   :  { %v952_v52 = vsub.f32 %v943_v42, %v951_v51 }
 0x3c7   :  { %v953_v53 = vmul.f32 %v952_v52, %v952_v52 }
 0x3c9   :  { %v954_v54 = vsel %vm946_vm1, %v953_v53, 0.0 }
 0x3ca   :  { %955 = vadd.xlane.f32.xlu0 %v954_v54 }
 0x453   :  { %v956_v16 = vpop.xlane.xlu0 %955 }
 0x454   :  { %v957_v17 = vmul.f32 0.0078125, %v956_v16 }
 0x456   :  { %v958_v18 = vadd.f32 1e-05, %v957_v17  ;;  %v2926_v17 = vld [vmem:[%s4382_s14] ss:$0 sm:$0xff] }
 0x458   :  { %3686 = vrsqrt.f32 %v958_v18 }
 0x465   :  { %v3687_v19 = vpop.eup %3686 }
 0x466   :  { %v960_v21 = vmul.f32 %v3687_v19, %v952_v52  ;;  %v2927_v19 = vld [vmem:[%s4383_s15] ss:$0 sm:$0xff] }
 0x468   :  { %v967_v23 = vmul.f32 %v2891_v20, %v960_v21 }
 0x46a   :  { %v974_v24 = vadd.f32 %v2892_v22, %v967_v23  ;;  %v3573_v23 = vld [vmem:[#allocation11 + $0x40] sm:$0xff]  }
 0x46c   :  { %v975_v25 = vpack.c.bf16 %v974_v24, %v974_v24 }
 0x46e   :  { %1117 = vmatmul.mubr.bf16.vlgmr.msra.gmra.mxu1 %v975_v25 }
 0x46f   :  { %3331 = vmatprep.mubr.msk.bf16.mxu1 %vm4017_vm0, %v4016_v40  ;;  %3316 = vmatpush3.bf16.msra.mxu1 %v3558_v56  ;;  %v3585_v56 = vld [vmem:[#allocation17 + $0xc4] ss:$8 sps:$4 sm:$0xff]  }
 0x470   :  { %3317 = vmatprep.subr.bf16.mxu1 %v4016_v40 }
 0x473   :  { %3318 = vmatpush3.bf16.msra.mxu1 %v3559_v57  ;;  %v3588_v57 = vld [vmem:[#allocation17 + $0xb4] ss:$8 sps:$4 sm:$0xff]  }
 0x474   :  { %3319 = vmatprep.subr.bf16.mxu1 %v4016_v40 }
 0x477   :  { %3320 = vmatpush3.bf16.msra.mxu1 %v3560_v0  ;;  %v3597_v0 = vld [vmem:[#allocation17 + $0x84] ss:$8 sps:$4 sm:$0xff]  }
 0x478   :  { %3321 = vmatprep.subr.bf16.mxu1 %v4016_v40 }
 0x47b   :  { %3322 = vmatpush3.bf16.msra.mxu1 %v3561_v1  ;;  %v3595_v1 = vld [vmem:[#allocation17 + $0x80] ss:$8 sps:$4 sm:$0xff]  }
 0x47c   :  { %3323 = vmatprep.subr.bf16.mxu1 %v4016_v40 }
 0x47f   :  { %3324 = vmatpush3.bf16.msra.mxu1 %v3562_v2  ;;  %v3598_v2 = vld [vmem:[#allocation19 + $0xf8] sm:$0xff]  }
 0x480   :  { %3325 = vmatprep.subr.bf16.mxu1 %v4016_v40 }
 0x483   :  { %3326 = vmatpush3.bf16.msra.mxu1 %v3563_v3  ;;  %v3599_v3 = vld [vmem:[#allocation19 + $0xb8] sm:$0xff]  }
 0x484   :  { %3327 = vmatprep.subr.bf16.mxu1 %v4016_v40 }
 0x487   :  { %3328 = vmatpush3.bf16.msra.mxu1 %v3564_v4  ;;  %v3600_v4 = vld [vmem:[#allocation19 + $0xf0] sm:$0xff]  }
 0x488   :  { %3329 = vmatprep.subr.bf16.mxu1 %v4016_v40 }
 0x48b   :  { %3330 = vmatpush3.bf16.msra.mxu1 %v3565_v5  ;;  %v3601_v5 = vld [vmem:[#allocation19 + $0xb0] sm:$0xff]  }
 0x52e   :  { %v1118_v37 = vpop.f32.mrf.mxu1 }
 0x52f   :  { %v1119_v38 = vadd.f32 %v1118_v37, %v997_v35 }
 0x530   :  { %v1120_v39 = vpop.f32.mrf.mxu1 }
 0x531   :  { %v1121_v41 = vadd.f32 %v1120_v39, %v1001_v36  ;;  %v1125_v42 = vmax.f32 %v1119_v38, 0.0  ;;  %v2937_v36 = vld [vmem:[#allocation13 + $0x1] ss:$0 sm:$0xff] }
 0x532   :  { %v1122_v43 = vpop.f32.mrf.mxu1 }
 0x533   :  { %v1126_v44 = vmax.f32 %v1121_v41, 0.0  ;;  %v1127_v47 = vpack.c.bf16 %v1125_v42, %v1125_v42 }
 0x534   :  { %v1123_v45 = vpop.f32.mrf.mxu1 }
 0x535   :  { %v1128_v46 = vpack.c.bf16 %v1126_v44, %v1126_v44  ;;  %v3574_v45 = vld [vmem:[#allocation17 + $0xf0] ss:$8 sps:$4 sm:$0xff]  }
 0x537   :  { %1296 = vmatprep.mubr.bf16.mxu0 %v1128_v46  ;;  %v3576_v46 = vld [vmem:[#allocation17 + $0xf4] ss:$8 sps:$4 sm:$0xff]  }
 0x538   :  { %1297 = vmatmul.mubr.bf16.vlgmr.msra.gmra.mxu0 %v1127_v47  ;;  %v3579_v47 = vld [vmem:[#allocation17 + $0xe4] ss:$8 sps:$4 sm:$0xff]   ;;  %1705 = vmatprep.subr.bf16.mxu1 %v3576_v46 }
 0x539   :  { %3351 = vmatprep.mubr.msk.bf16.mxu0 %vm4017_vm0, %v4016_v40  ;;  %3336 = vmatpush3.bf16.msra.mxu0 %v3566_v6  ;;  %v3602_v6 = vld [vmem:[#allocation19 + $0xe8] sm:$0xff]  }
 0x53a   :  { %3337 = vmatprep.subr.bf16.mxu0 %v4016_v40 }
 0x53d   :  { %3338 = vmatpush3.bf16.msra.mxu0 %v3567_v7  ;;  %v3603_v7 = vld [vmem:[#allocation19 + $0xa8] sm:$0xff]  }
 0x53e   :  { %3339 = vmatprep.subr.bf16.mxu0 %v4016_v40 }
 0x541   :  { %3340 = vmatpush3.bf16.msra.mxu0 %v3568_v8  ;;  %v3604_v8 = vld [vmem:[#allocation19 + $0xe0] sm:$0xff]  }
 0x542   :  { %3341 = vmatprep.subr.bf16.mxu0 %v4016_v40 }
 0x545   :  { %3342 = vmatpush3.bf16.msra.mxu0 %v3569_v9  ;;  %v3605_v9 = vld [vmem:[#allocation19 + $0xa0] sm:$0xff]  }
 0x546   :  { %3343 = vmatprep.subr.bf16.mxu0 %v4016_v40 }
 0x549   :  { %3344 = vmatpush3.bf16.msra.mxu0 %v3570_v10  ;;  %v3606_v10 = vld [vmem:[#allocation19 + $0xd8] sm:$0xff]  }
 0x54a   :  { %3345 = vmatprep.subr.bf16.mxu0 %v4016_v40 }
 0x54d   :  { %3346 = vmatpush3.bf16.msra.mxu0 %v3571_v11  ;;  %v3607_v11 = vld [vmem:[#allocation19 + $0x98] sm:$0xff]  }
 0x54e   :  { %3347 = vmatprep.subr.bf16.mxu0 %v4016_v40 }
 0x551   :  { %3348 = vmatpush3.bf16.msra.mxu0 %v3572_v12  ;;  %v3608_v12 = vld [vmem:[#allocation19 + $0xd0] sm:$0xff]  }
 0x552   :  { %3349 = vmatprep.subr.bf16.mxu0 %v4016_v40 }
 0x555   :  { %3350 = vmatpush3.bf16.msra.mxu0 %v3573_v23 }
 0x556   :  { %3175 = vmatprep.subr.bf16.mxu0 %v3598_v2  ;;  %v3620_v2 = vld [vmem:[#allocation10 + $0x1a0] ss:$12 sps:$4 sm:$0xff]  }
 0x5f8   :  { %v3151_v29 = vpop.f32.mrf.mxu0 }
 0x5fa   :  { %v3152_v49 = vpop.f32.mrf.mxu0 }
 0x5fb   :  { %v3153_v50 = vadd.f32 %v3152_v49, %v3151_v29  ;;  %v3577_v29 = vld [vmem:[#allocation17 + $0xe0] ss:$8 sps:$4 sm:$0xff]  }
 0x5fc   :  { %v3154_v51 = vpop.f32.mrf.mxu0 }
 0x5fd   :  { %v1299_v52 = vadd.f32 %v3153_v50, %v2909_v48 }
 0x5fe   :  { %v3155_v53 = vpop.f32.mrf.mxu0 }
 0x5ff   :  { %v1304_v54 = vadd.f32 %v1299_v52, %v974_v24  ;;  %v2928_v24 = vld [vmem:[%s4373_s5 + $0x3] sm:$0x7]  ;;  %v3582_v53 = vld [vmem:[#allocation17 + $0xd4] ss:$8 sps:$4 sm:$0xff]  }
 0x600   :  { %v1358_v25 = vrot.slane %v2928_v24, %v4222_v27  ;;  %v3610_v24 = vld [vmem:[#allocation19 + $0xc8] sm:$0xff]  }
 0x601   :  { %v1307_v55 = vsel %vm946_vm1, %v1304_v54, 0.0 }
 0x602   :  { %1308 = vadd.xlane.f32.xlu1 %v1307_v55  ;;  %v3583_v55 = vld [vmem:[#allocation17 + $0xc0] ss:$8 sps:$4 sm:$0xff]  }
 0x68b   :  { %v1309_v58 = vpop.xlane.xlu1 %1308 }
 0x68c   :  { %v1310_v59 = vmul.f32 0.0078125, %v1309_v58  ;;  %v3586_v58 = vld [vmem:[#allocation17 + $0xb0] ss:$8 sps:$4 sm:$0xff]  }
 0x68e   :  { %v1311_v60 = vsub.f32 %v1304_v54, %v1310_v59  ;;  %v3580_v54 = vld [vmem:[#allocation17 + $0xd0] ss:$8 sps:$4 sm:$0xff]   ;;  %v3591_v59 = vld [vmem:[#allocation17 + $0xa4] ss:$8 sps:$4 sm:$0xff]  }
 0x690   :  { %v1312_v61 = vmul.f32 %v1311_v60, %v1311_v60 }
 0x692   :  { %v1313_v63 = vsel %vm946_vm1, %v1312_v61, 0.0  ;;  %v3594_v61 = vld [vmem:[#allocation17 + $0x94] ss:$8 sps:$4 sm:$0xff]  }
 0x693   :  { %1314 = vadd.xlane.f32.xlu1 %v1313_v63  ;;  %v3592_v63 = vld [vmem:[#allocation17 + $0x90] ss:$8 sps:$4 sm:$0xff]  }
 0x71c   :  { %v1315_v13 = vpop.xlane.xlu1 %1314 }
 0x71d   :  { %v1316_v14 = vmul.f32 0.0078125, %v1315_v13  ;;  %v3609_v13 = vld [vmem:[#allocation19 + $0x90] sm:$0xff]  }
 0x71f   :  { %v1317_v15 = vadd.f32 1e-05, %v1316_v14 }
 0x721   :  { %3688 = vrsqrt.f32 %v1317_v15 }
 0x72e   :  { %v3689_v16 = vpop.eup %3688 }
 0x72f   :  { %v1319_v18 = vmul.f32 %v3689_v16, %v1311_v60  ;;  %v3589_v60 = vld [vmem:[#allocation17 + $0xa0] ss:$8 sps:$4 sm:$0xff]  }
 0x731   :  { %v1326_v20 = vmul.f32 %v2926_v17, %v1319_v18  ;;  %v2946_v18 = vld [vmem:[#allocation14 + $0x1] ss:$0 sm:$0xff] }
 0x733   :  { %v1333_v21 = vadd.f32 %v2927_v19, %v1326_v20  ;;  %v2947_v20 = vld [vmem:[#allocation16 + $0x1] ss:$0 sm:$0xff] }
 0x735   :  { %v1334_v22 = vpack.c.bf16 %v1333_v21, %v1333_v21 }
 0x737   :  { %3332 = vmatmul.mubr.bf16.vlgmr.msra.gmra.mxu1 %v1334_v22 }
 0x738   :  { %1737 = vmatprep.mubr.bf16.mxu1 %v4018_v62  ;;  %1706 = vmatpush1.bf16.msra.mxu1 %v3574_v45 }
 0x739   :  { %1707 = vmatprep.subr.bf16.mxu1 %v3579_v47  ;;  %v2966_v47 = vld [vmem:[%s4381_s13 + $0x1] ss:$0 sm:$0xff] }
 0x73c   :  { %1708 = vmatpush1.bf16.msra.mxu1 %v3577_v29 }
 0x73d   :  { %1709 = vmatprep.subr.bf16.mxu1 %v3582_v53 }
 0x740   :  { %1710 = vmatpush1.bf16.msra.mxu1 %v3580_v54  ;;  %v3614_v54 = vld [vmem:[#allocation10 + $0x230] ss:$12 sps:$4 sm:$0xff]  }
 0x741   :  { %1711 = vmatprep.subr.bf16.mxu1 %v3585_v56 }
 0x744   :  { %1712 = vmatpush1.bf16.msra.mxu1 %v3583_v55  ;;  %v3615_v55 = vld [vmem:[#allocation10 + $0x218] ss:$12 sps:$4 sm:$0xff]  }
 0x745   :  { %1713 = vmatprep.subr.bf16.mxu1 %v3588_v57 }
 0x748   :  { %1714 = vmatpush1.bf16.msra.mxu1 %v3586_v58 }
 0x749   :  { %1715 = vmatprep.subr.bf16.mxu1 %v3591_v59 }
 0x74c   :  { %1716 = vmatpush1.bf16.msra.mxu1 %v3589_v60 }
 0x74d   :  { %1717 = vmatprep.subr.bf16.mxu1 %v3594_v61  ;;  %v3616_v61 = vld [vmem:[#allocation10 + $0x200] ss:$12 sps:$4 sm:$0xff]  }
 0x750   :  { %1718 = vmatpush1.bf16.msra.mxu1 %v3592_v63  ;;  %v3617_v63 = vld [vmem:[#allocation10 + $0x1e8] ss:$12 sps:$4 sm:$0xff]  }
 0x751   :  { %1719 = vmatprep.subr.bf16.mxu1 %v3597_v0  ;;  %v3618_v0 = vld [vmem:[#allocation10 + $0x1d0] ss:$12 sps:$4 sm:$0xff]  }
 0x754   :  { %1720 = vmatpush1.bf16.msra.mxu1 %v3595_v1  ;;  %v3619_v1 = vld [vmem:[#allocation10 + $0x1b8] ss:$12 sps:$4 sm:$0xff]  }
 0x755   :  { %3355 = vmatprep.subr.bf16.mxu1 %v4016_v40 }
 0x7f7   :  { %v1442_v26 = vpop.f32.mrf.mxu1 }
 0x7f8   :  { %v1443_v28 = vadd.f32 %v1442_v26, %v1358_v25  ;;  %v3611_v25 = vld [vmem:[#allocation19 + $0x88] sm:$0xff]   ;;  %v3612_v26 = vld [vmem:[#allocation19 + $0xc0] sm:$0xff]  }
 0x7f9   :  { %v3333_v30 = vpop.f32.mrf.mxu1 }
 0x7fa   :  { %v1448_v31 = vpack.c.bf16 %v1443_v28, %v1443_v28  ;;  %v3613_v28 = vld [vmem:[#allocation19 + $0x80] sm:$0xff]  }
 0x7fb   :  { %v1445_v33 = vpop.f32.mrf.mxu1  ;;  %v2948_v30 = vld [vmem:[%s4379_s11 + $0x2] sm:$0x3] }
 0x7fc   :  { %3352 = vmatmul.mubr.bf16.vlgmr.msra.gmra.mxu0 %v1448_v31  ;;  %v1618_v31 = vrot.slane %v2948_v30, %v4236_v32  ;;  %v1622_v33 = vrot.slane %v2948_v30, %v4242_v34 }
 0x7fd   :  { %v3334_v35 = vpop.f32.mrf.mxu1  ;;  %3176 = vmatpush3.bf16.msra.mxu0 %v3599_v3  ;;  %v3621_v3 = vld [vmem:[#allocation10 + $0x188] ss:$12 sps:$4 sm:$0xff]  }
 0x7fe   :  { %3177 = vmatprep.subr.bf16.mxu0 %v3600_v4  ;;  %v3622_v4 = vld [vmem:[#allocation11 + $0xb8] sm:$0xff]  }
 0x801   :  { %3178 = vmatpush3.bf16.msra.mxu0 %v3601_v5  ;;  %v3623_v5 = vld [vmem:[#allocation11 + $0xb0] sm:$0xff]  }
 0x802   :  { %3179 = vmatprep.subr.bf16.mxu0 %v3602_v6  ;;  %v3624_v6 = vld [vmem:[#allocation11 + $0xa8] sm:$0xff]  }
 0x805   :  { %3180 = vmatpush3.bf16.msra.mxu0 %v3603_v7  ;;  %v3625_v7 = vld [vmem:[#allocation11 + $0xa0] sm:$0xff]  }
 0x806   :  { %3181 = vmatprep.subr.bf16.mxu0 %v3604_v8  ;;  %v3626_v8 = vld [vmem:[#allocation11 + $0x98] sm:$0xff]  }
 0x809   :  { %3182 = vmatpush3.bf16.msra.mxu0 %v3605_v9  ;;  %v3627_v9 = vld [vmem:[#allocation11 + $0x90] sm:$0xff]  }
 0x80a   :  { %3183 = vmatprep.subr.bf16.mxu0 %v3606_v10  ;;  %v3628_v10 = vld [vmem:[#allocation11 + $0x88] sm:$0xff]  }
 0x80d   :  { %3184 = vmatpush3.bf16.msra.mxu0 %v3607_v11 }
 0x80e   :  { %3185 = vmatprep.subr.bf16.mxu0 %v3608_v12 }
 0x811   :  { %3186 = vmatpush3.bf16.msra.mxu0 %v3609_v13 }
 0x812   :  { %3187 = vmatprep.subr.bf16.mxu0 %v3610_v24 }
 0x815   :  { %3188 = vmatpush3.bf16.msra.mxu0 %v3611_v25 }
 0x816   :  { %3189 = vmatprep.subr.bf16.mxu0 %v3612_v26 }
 0x819   :  { %3190 = vmatpush3.bf16.msra.mxu0 %v3613_v28 }
 0x81a   :  { %3375 = vmatprep.subr.bf16.mxu0 %v4016_v40 }
 0x8bc   :  { %v1556_v37 = vpop.f32.mrf.mxu0 }
 0x8bd   :  { %v1557_v38 = vadd.f32 %v2937_v36, %v1556_v37 }
 0x8be   :  { %v3353_v39 = vpop.f32.mrf.mxu0 }
 0x8bf   :  { %v1562_v41 = vadd.f32 %v1557_v38, %v1333_v21 }
 0x8c0   :  { %v1559_v42 = vpop.f32.mrf.mxu0 }
 0x8c1   :  { %v1567_v43 = vsel %vm946_vm1, %v1562_v41, 0.0 }
 0x8c2   :  { %1568 = vadd.xlane.f32.xlu0 %v1567_v43  ;;  %v3354_v44 = vpop.f32.mrf.mxu0 }
 0x94b   :  { %v1569_v48 = vpop.xlane.xlu0 %1568 }
 0x94c   :  { %v1570_v49 = vmul.f32 0.0078125, %v1569_v48 }
 0x94e   :  { %v1571_v50 = vsub.f32 %v1562_v41, %v1570_v49 }
 0x950   :  { %v1572_v51 = vmul.f32 %v1571_v50, %v1571_v50 }
 0x952   :  { %v1573_v52 = vsel %vm946_vm1, %v1572_v51, 0.0 }
 0x953   :  { %1574 = vadd.xlane.f32.xlu1 %v1573_v52 }
 0x9dc   :  { %v1575_v14 = vpop.xlane.xlu1 %1574 }
 0x9dd   :  { %v1576_v15 = vmul.f32 0.0078125, %v1575_v14 }
 0x9df   :  { %v1577_v16 = vadd.f32 1e-05, %v1576_v15  ;;  %v2985_v15 = vld [vmem:[%s4382_s14 + $0x1] ss:$0 sm:$0xff] }
 0x9e1   :  { %3690 = vrsqrt.f32 %v1577_v16 }
 0x9ee   :  { %v3691_v17 = vpop.eup %3690 }
 0x9ef   :  { %v1579_v19 = vmul.f32 %v3691_v17, %v1571_v50  ;;  %v2986_v17 = vld [vmem:[%s4383_s15 + $0x1] ss:$0 sm:$0xff] }
 0x9f1   :  { %v1586_v21 = vmul.f32 %v2946_v18, %v1579_v19 }
 0x9f3   :  { %v1593_v22 = vadd.f32 %v2947_v20, %v1586_v21  ;;  %v3629_v21 = vld [vmem:[#allocation11 + $0x80] sm:$0xff]  }
 0x9f5   :  { %v1594_v23 = vpack.c.bf16 %v1593_v22, %v1593_v22 }
 0x9f7   :  { %1738 = vmatmul.mubr.bf16.vlgmr.msra.gmra.mxu1 %v1594_v23 }
 0x9f8   :  { %3371 = vmatprep.mubr.msk.bf16.mxu1 %vm4017_vm0, %v4016_v40  ;;  %3356 = vmatpush3.bf16.msra.mxu1 %v3614_v54  ;;  %v3642_v54 = vld [vmem:[#allocation17 + $0x130] ss:$8 sps:$4 sm:$0xff]  }
 0x9f9   :  { %3357 = vmatprep.subr.bf16.mxu1 %v4016_v40 }
 0x9fc   :  { %3358 = vmatpush3.bf16.msra.mxu1 %v3615_v55  ;;  %v3647_v55 = vld [vmem:[#allocation17 + $0x124] ss:$8 sps:$4 sm:$0xff]  }
 0x9fd   :  { %3359 = vmatprep.subr.bf16.mxu1 %v4016_v40 }
 0xa00   :  { %3360 = vmatpush3.bf16.msra.mxu1 %v3616_v61  ;;  %v3654_v61 = vld [vmem:[#allocation19 + $0x178] sm:$0xff]  }
 0xa01   :  { %3361 = vmatprep.subr.bf16.mxu1 %v4016_v40 }
 0xa04   :  { %3362 = vmatpush3.bf16.msra.mxu1 %v3617_v63  ;;  %v3655_v63 = vld [vmem:[#allocation19 + $0x138] sm:$0xff]  }
 0xa05   :  { %3363 = vmatprep.subr.bf16.mxu1 %v4016_v40 }
 0xa08   :  { %3364 = vmatpush3.bf16.msra.mxu1 %v3618_v0  ;;  %v3656_v0 = vld [vmem:[#allocation19 + $0x170] sm:$0xff]  }
 0xa09   :  { %3365 = vmatprep.subr.bf16.mxu1 %v4016_v40 }
 0xa0c   :  { %3366 = vmatpush3.bf16.msra.mxu1 %v3619_v1  ;;  %v3657_v1 = vld [vmem:[#allocation19 + $0x130] sm:$0xff]  }
 0xa0d   :  { %3367 = vmatprep.subr.bf16.mxu1 %v4016_v40 }
 0xa10   :  { %3368 = vmatpush3.bf16.msra.mxu1 %v3620_v2  ;;  %v3658_v2 = vld [vmem:[#allocation19 + $0x168] sm:$0xff]  }
 0xa11   :  { %3369 = vmatprep.subr.bf16.mxu1 %v4016_v40 }
 0xa14   :  { %3370 = vmatpush3.bf16.msra.mxu1 %v3621_v3  ;;  %v3659_v3 = vld [vmem:[#allocation19 + $0x128] sm:$0xff]  }
 0xab7   :  { %v1739_v35 = vpop.f32.mrf.mxu1 }
 0xab8   :  { %v1740_v36 = vadd.f32 %v1739_v35, %v1618_v31 }
 0xab9   :  { %v1741_v37 = vpop.f32.mrf.mxu1 }
 0xaba   :  { %v1742_v38 = vadd.f32 %v1741_v37, %v1622_v33  ;;  %v1746_v39 = vmax.f32 %v1740_v36, 0.0  ;;  %v2996_v33 = vld [vmem:[#allocation13 + $0x2] ss:$0 sm:$0xff] }
 0xabb   :  { %v1743_v41 = vpop.f32.mrf.mxu1 }
 0xabc   :  { %v1747_v42 = vmax.f32 %v1742_v38, 0.0  ;;  %v1748_v45 = vpack.c.bf16 %v1746_v39, %v1746_v39 }
 0xabd   :  { %v1744_v43 = vpop.f32.mrf.mxu1 }
 0xabe   :  { %v1749_v44 = vpack.c.bf16 %v1747_v42, %v1747_v42  ;;  %v3630_v42 = vld [vmem:[#allocation17 + $0x170] ss:$8 sps:$4 sm:$0xff]   ;;  %v3632_v43 = vld [vmem:[#allocation17 + $0x174] ss:$8 sps:$4 sm:$0xff]  }
 0xabf   :  { %2330 = vmatprep.subr.bf16.mxu1 %v3632_v43 }
 0xac0   :  { %1919 = vmatprep.mubr.bf16.mxu0 %v1749_v44  ;;  %v3633_v44 = vld [vmem:[#allocation17 + $0x160] ss:$8 sps:$4 sm:$0xff]  }
 0xac1   :  { %1920 = vmatmul.mubr.bf16.vlgmr.msra.gmra.mxu0 %v1748_v45 }
 0xac2   :  { %3391 = vmatprep.mubr.msk.bf16.mxu0 %vm4017_vm0, %v4016_v40  ;;  %3376 = vmatpush3.bf16.msra.mxu0 %v3622_v4  ;;  %v3660_v4 = vld [vmem:[#allocation19 + $0x160] sm:$0xff]  }
 0xac3   :  { %3377 = vmatprep.subr.bf16.mxu0 %v4016_v40 }
 0xac6   :  { %3378 = vmatpush3.bf16.msra.mxu0 %v3623_v5  ;;  %v3661_v5 = vld [vmem:[#allocation19 + $0x120] sm:$0xff]  }
 0xac7   :  { %3379 = vmatprep.subr.bf16.mxu0 %v4016_v40 }
 0xaca   :  { %3380 = vmatpush3.bf16.msra.mxu0 %v3624_v6  ;;  %v3662_v6 = vld [vmem:[#allocation19 + $0x158] sm:$0xff]  }
 0xacb   :  { %3381 = vmatprep.subr.bf16.mxu0 %v4016_v40 }
 0xace   :  { %3382 = vmatpush3.bf16.msra.mxu0 %v3625_v7  ;;  %v3663_v7 = vld [vmem:[#allocation19 + $0x118] sm:$0xff]  }
 0xacf   :  { %3383 = vmatprep.subr.bf16.mxu0 %v4016_v40 }
 0xad2   :  { %3384 = vmatpush3.bf16.msra.mxu0 %v3626_v8  ;;  %v3664_v8 = vld [vmem:[#allocation19 + $0x150] sm:$0xff]  }
 0xad3   :  { %3385 = vmatprep.subr.bf16.mxu0 %v4016_v40 }
 0xad6   :  { %3386 = vmatpush3.bf16.msra.mxu0 %v3627_v9  ;;  %v3665_v9 = vld [vmem:[#allocation19 + $0x110] sm:$0xff]  }
 0xad7   :  { %3387 = vmatprep.subr.bf16.mxu0 %v4016_v40 }
 0xada   :  { %3388 = vmatpush3.bf16.msra.mxu0 %v3628_v10 }
 0xadb   :  { %3389 = vmatprep.subr.bf16.mxu0 %v4016_v40 }
 0xade   :  { %3390 = vmatpush3.bf16.msra.mxu0 %v3629_v21  ;;  %v3667_v21 = vld [vmem:[#allocation19 + $0x108] sm:$0xff]  }
 0xadf   :  { %3215 = vmatprep.subr.bf16.mxu0 %v3654_v61  ;;  %v3680_v61 = vld [vmem:[#allocation22 + $0x28] sm:$0xff]  }
 0xb81   :  { %v3191_v46 = vpop.f32.mrf.mxu0 }
 0xb83   :  { %v3192_v29 = vpop.f32.mrf.mxu0 }
 0xb84   :  { %v3193_v48 = vadd.f32 %v3192_v29, %v3191_v46 }
 0xb85   :  { %v3194_v49 = vpop.f32.mrf.mxu0 }
 0xb86   :  { %v1922_v50 = vadd.f32 %v3193_v48, %v2966_v47  ;;  %v3638_v49 = vld [vmem:[#allocation17 + $0x154] ss:$8 sps:$4 sm:$0xff]  }
 0xb87   :  { %v3195_v51 = vpop.f32.mrf.mxu0 }
 0xb88   :  { %v1927_v52 = vadd.f32 %v1922_v50, %v1593_v22  ;;  %v2987_v22 = vld [vmem:[%s4373_s5 + $0x6] sm:$0x7]  ;;  %v3636_v50 = vld [vmem:[#allocation17 + $0x150] ss:$8 sps:$4 sm:$0xff]  }
 0xb89   :  { %v1983_v23 = vrot.slane %v2987_v22, %v4222_v27  ;;  %v3635_v27 = vld [vmem:[#allocation17 + $0x164] ss:$8 sps:$4 sm:$0xff]   ;;  %v3639_v51 = vld [vmem:[#allocation17 + $0x140] ss:$8 sps:$4 sm:$0xff]  }
 0xb8a   :  { %v1932_v53 = vsel %vm946_vm1, %v1927_v52, 0.0  ;;  %v3668_v22 = vld [vmem:[#allocation19 + $0x140] sm:$0xff]  }
 0xb8b   :  { %1933 = vadd.xlane.f32.xlu0 %v1932_v53  ;;  %v3644_v53 = vld [vmem:[#allocation17 + $0x134] ss:$8 sps:$4 sm:$0xff]  }
 0xc14   :  { %v1934_v56 = vpop.xlane.xlu0 %1933 }
 0xc15   :  { %v1935_v57 = vmul.f32 0.0078125, %v1934_v56  ;;  %v3645_v56 = vld [vmem:[#allocation17 + $0x120] ss:$8 sps:$4 sm:$0xff]  }
 0xc17   :  { %v1936_v58 = vsub.f32 %v1927_v52, %v1935_v57  ;;  %v3641_v52 = vld [vmem:[#allocation17 + $0x144] ss:$8 sps:$4 sm:$0xff]   ;;  %v3650_v57 = vld [vmem:[#allocation17 + $0x114] ss:$8 sps:$4 sm:$0xff]  }
 0xc19   :  { %v1937_v59 = vmul.f32 %v1936_v58, %v1936_v58 }
 0xc1b   :  { %v1938_v60 = vsel %vm946_vm1, %v1937_v59, 0.0  ;;  %v3653_v59 = vld [vmem:[#allocation17 + $0x104] ss:$8 sps:$4 sm:$0xff]  }
 0xc1c   :  { %1939 = vadd.xlane.f32.xlu1 %v1938_v60  ;;  %v3651_v60 = vld [vmem:[#allocation17 + $0x100] ss:$8 sps:$4 sm:$0xff]  }
 0xca5   :  { %v1940_v11 = vpop.xlane.xlu1 %1939 }
 0xca6   :  { %v1941_v12 = vmul.f32 0.0078125, %v1940_v11 }
 0xca8   :  { %v1942_v13 = vadd.f32 1e-05, %v1941_v12 }
 0xcaa   :  { %3692 = vrsqrt.f32 %v1942_v13 }
 0xcb7   :  { %v3693_v14 = vpop.eup %3692 }
 0xcb8   :  { %v1944_v16 = vmul.f32 %v3693_v14, %v1936_v58  ;;  %v3648_v58 = vld [vmem:[#allocation17 + $0x110] ss:$8 sps:$4 sm:$0xff]  }
 0xcb9   :  { %v3005_v14 = vld [vmem:[#allocation14 + $0x2] ss:$0 sm:$0xff] }
 0xcba   :  { %v1951_v18 = vmul.f32 %v2985_v15, %v1944_v16  ;;  %v3006_v16 = vld [vmem:[#allocation16 + $0x2] ss:$0 sm:$0xff] }
 0xcbc   :  { %v1958_v19 = vadd.f32 %v2986_v17, %v1951_v18 }
 0xcbe   :  { %v1959_v20 = vpack.c.bf16 %v1958_v19, %v1958_v19 }
 0xcc0   :  { %3372 = vmatmul.mubr.bf16.vlgmr.msra.gmra.mxu1 %v1959_v20  ;;  %v3666_v20 = vld [vmem:[#allocation19 + $0x148] sm:$0xff]  }
 0xcc1   :  { %2362 = vmatprep.mubr.bf16.mxu1 %v4018_v62  ;;  %2331 = vmatpush1.bf16.msra.mxu1 %v3630_v42 }
 0xcc2   :  { %2332 = vmatprep.subr.bf16.mxu1 %v3635_v27 }
 0xcc5   :  { %2333 = vmatpush1.bf16.msra.mxu1 %v3633_v44 }
 0xcc6   :  { %2334 = vmatprep.subr.bf16.mxu1 %v3638_v49 }
 0xcc9   :  { %2335 = vmatpush1.bf16.msra.mxu1 %v3636_v50 }
 0xcca   :  { %2336 = vmatprep.subr.bf16.mxu1 %v3641_v52 }
 0xccd   :  { %2337 = vmatpush1.bf16.msra.mxu1 %v3639_v51 }
 0xcce   :  { %2338 = vmatprep.subr.bf16.mxu1 %v3644_v53  ;;  %v3672_v53 = vld [vmem:[#allocation20 + $0x28] sm:$0xff]  }
 0xcd1   :  { %2339 = vmatpush1.bf16.msra.mxu1 %v3642_v54  ;;  %v3673_v54 = vld [vmem:[#allocation20 + $0x20] sm:$0xff]  }
 0xcd2   :  { %2340 = vmatprep.subr.bf16.mxu1 %v3647_v55  ;;  %v3674_v55 = vld [vmem:[#allocation20 + $0x18] sm:$0xff]  }
 0xcd5   :  { %2341 = vmatpush1.bf16.msra.mxu1 %v3645_v56  ;;  %v3675_v56 = vld [vmem:[#allocation20 + $0x10] sm:$0xff]  }
 0xcd6   :  { %2342 = vmatprep.subr.bf16.mxu1 %v3650_v57  ;;  %v3676_v57 = vld [vmem:[#allocation20 + $0x8] sm:$0xff]  }
 0xcd9   :  { %2343 = vmatpush1.bf16.msra.mxu1 %v3648_v58  ;;  %v3677_v58 = vld [vmem:[#allocation20] sm:$0xff]  }
 0xcda   :  { %2344 = vmatprep.subr.bf16.mxu1 %v3653_v59  ;;  %v3678_v59 = vld [vmem:[#allocation22 + $0x38] sm:$0xff]  }
 0xcdd   :  { %2345 = vmatpush1.bf16.msra.mxu1 %v3651_v60  ;;  %v3679_v60 = vld [vmem:[#allocation22 + $0x30] sm:$0xff]  }
 0xcde   :  { %3395 = vmatprep.subr.bf16.mxu1 %v4016_v40 }
 0xd80   :  { %v2067_v24 = vpop.f32.mrf.mxu1 }
 0xd81   :  { %v2068_v25 = vadd.f32 %v2067_v24, %v1983_v23  ;;  %v3669_v23 = vld [vmem:[#allocation19 + $0x100] sm:$0xff]   ;;  %v3007_v24 = vld [vmem:[%s4379_s11 + $0x4] sm:$0x3] }
 0xd82   :  { %v3373_v26 = vpop.f32.mrf.mxu1 }
 0xd83   :  { %v2073_v28 = vpack.c.bf16 %v2068_v25, %v2068_v25  ;;  %v2243_v25 = vrot.slane %v3007_v24, %v4236_v32  ;;  %v2247_v26 = vrot.slane %v3007_v24, %v4242_v34  ;;  %v3025_v32 = vld [vmem:[%s4381_s13 + $0x2] ss:$0 sm:$0xff] }
 0xd84   :  { %v2070_v30 = vpop.f32.mrf.mxu1 }
 0xd85   :  { %3392 = vmatmul.mubr.bf16.vlgmr.msra.gmra.mxu0 %v2073_v28 }
 0xd86   :  { %v3374_v31 = vpop.f32.mrf.mxu1  ;;  %3216 = vmatpush3.bf16.msra.mxu0 %v3655_v63  ;;  %v3681_v63 = vld [vmem:[#allocation22 + $0x20] sm:$0xff]  }
 0xd87   :  { %3217 = vmatprep.subr.bf16.mxu0 %v3656_v0  ;;  %v3682_v0 = vld [vmem:[#allocation22 + $0x18] sm:$0xff]  }
 0xd8a   :  { %3218 = vmatpush3.bf16.msra.mxu0 %v3657_v1  ;;  %v3683_v1 = vld [vmem:[#allocation22 + $0x10] sm:$0xff]  }
 0xd8b   :  { %3219 = vmatprep.subr.bf16.mxu0 %v3658_v2 }
 0xd8e   :  { %3220 = vmatpush3.bf16.msra.mxu0 %v3659_v3 }
 0xd8f   :  { %3221 = vmatprep.subr.bf16.mxu0 %v3660_v4 }
 0xd92   :  { %3222 = vmatpush3.bf16.msra.mxu0 %v3661_v5 }
 0xd93   :  { %3223 = vmatprep.subr.bf16.mxu0 %v3662_v6  ;;  %v3044_v6 = vld [vmem:[%s4382_s14 + $0x2] ss:$0 sm:$0xff] }
 0xd96   :  { %3224 = vmatpush3.bf16.msra.mxu0 %v3663_v7 }
 0xd97   :  { %3225 = vmatprep.subr.bf16.mxu0 %v3664_v8  ;;  %v3045_v8 = vld [vmem:[%s4383_s15 + $0x2] ss:$0 sm:$0xff] }
 0xd9a   :  { %3226 = vmatpush3.bf16.msra.mxu0 %v3665_v9 }
 0xd9b   :  { %3227 = vmatprep.subr.bf16.mxu0 %v3666_v20 }
 0xd9e   :  { %3228 = vmatpush3.bf16.msra.mxu0 %v3667_v21 }
 0xd9f   :  { %3229 = vmatprep.subr.bf16.mxu0 %v3668_v22  ;;  %v3055_v22 = vld [vmem:[%s4387_s19] ss:$0 sm:$0xff] }
 0xda2   :  { %3230 = vmatpush3.bf16.msra.mxu0 %v3669_v23 }
 0xda3   :  { %3415 = vmatprep.subr.bf16.mxu0 %v4016_v40 }
 0xe45   :  { %v2181_v35 = vpop.f32.mrf.mxu0 }
 0xe46   :  { %v2182_v36 = vadd.f32 %v2996_v33, %v2181_v35 }
 0xe47   :  { %v3393_v37 = vpop.f32.mrf.mxu0 }
 0xe48   :  { %v2187_v62 = vadd.f32 %v2182_v36, %v1958_v19 }
 0xe49   :  { %v2184_v38 = vpop.f32.mrf.mxu0 }
 0xe4a   :  { %v2192_v39 = vsel %vm946_vm1, %v2187_v62, 0.0 }
 0xe4b   :  { %2193 = vadd.xlane.f32.xlu0 %v2192_v39  ;;  %v3394_v41 = vpop.f32.mrf.mxu0 }
 0xed4   :  { %v2194_v45 = vpop.xlane.xlu0 %2193 }
 0xed5   :  { %v2195_v46 = vmul.f32 0.0078125, %v2194_v45 }
 0xed7   :  { %v2196_v47 = vsub.f32 %v2187_v62, %v2195_v46 }
 0xed9   :  { %v2197_v29 = vmul.f32 %v2196_v47, %v2196_v47 }
 0xedb   :  { %v2198_v48 = vsel %vm946_vm1, %v2197_v29, 0.0  ;;  %v3671_v29 = vld [vmem:[#allocation20 + $0x30] sm:$0xff]  }
 0xedc   :  { %2199 = vadd.xlane.f32.xlu1 %v2198_v48 }
 0xf65   :  { %v2200_v10 = vpop.xlane.xlu1 %2199 }
 0xf66   :  { %v2201_v11 = vmul.f32 0.0078125, %v2200_v10 }
 0xf68   :  { %v2202_v12 = vadd.f32 1e-05, %v2201_v11 }
 0xf6a   :  { %3694 = vrsqrt.f32 %v2202_v12  ;;  %v3684_v12 = vld [vmem:[#allocation22 + $0x8] sm:$0xff]  }
 0xf77   :  { %v3695_v13 = vpop.eup %3694 }
 0xf78   :  { %v2204_v15 = vmul.f32 %v3695_v13, %v2196_v47  ;;  %v3670_v47 = vld [vmem:[#allocation20 + $0x38] sm:$0xff]   ;;  %v3685_v13 = vld [vmem:[#allocation22] sm:$0xff]  }
 0xf7a   :  { %v2211_v17 = vmul.f32 %v3005_v14, %v2204_v15  ;;  %v3046_v14 = vld [vmem:[%s4385_s17] ss:$0 sm:$0xff]  ;;  %s3958_s17 = scalar_lea.vmem %s2818_s28, 32 }
 0xf7b   :  { %p3959_p9 = scmp.ne.s32.totalorder %s2818_s28, %s3958_s17  ;;  %p3964_p11 = scmp.lt.s32.totalorder %s3958_s17, %s3958_s17 }
 0xf7c   :  { %v2218_v18 = vadd.f32 %v3006_v16, %v2211_v17 }
 0xf7d   :  { %p3965_p12 = por %p3964_p11, %p3963_p10 }
 0xf7e   :  { %v2219_v19 = vpack.c.bf16 %v2218_v18, %v2218_v18 }
 0xf7f   :  { %p3966_p13 = pnand %p3965_p12, %p3959_p9 }
 0xf80   :  { %2363 = vmatmul.mubr.bf16.vlgmr.msra.gmra.mxu1 %v2219_v19 }
 0xf81   :  { %3411 = vmatprep.mubr.msk.bf16.mxu1 %vm4017_vm0, %v4016_v40  ;;  %3396 = vmatpush3.bf16.msra.mxu1 %v3670_v47 }
 0xf82   :  { %3397 = vmatprep.subr.bf16.mxu1 %v4016_v40 }
 0xf85   :  { %3398 = vmatpush3.bf16.msra.mxu1 %v3671_v29 }
 0xf86   :  { %3399 = vmatprep.subr.bf16.mxu1 %v4016_v40 }
 0xf89   :  { %3400 = vmatpush3.bf16.msra.mxu1 %v3672_v53 }
 0xf8a   :  { %3401 = vmatprep.subr.bf16.mxu1 %v4016_v40 }
 0xf8d   :  { %3402 = vmatpush3.bf16.msra.mxu1 %v3673_v54 }
 0xf8e   :  { %3403 = vmatprep.subr.bf16.mxu1 %v4016_v40 }
 0xf91   :  { %3404 = vmatpush3.bf16.msra.mxu1 %v3674_v55 }
 0xf92   :  { %3405 = vmatprep.subr.bf16.mxu1 %v4016_v40 }
 0xf95   :  { %3406 = vmatpush3.bf16.msra.mxu1 %v3675_v56 }
 0xf96   :  { %3407 = vmatprep.subr.bf16.mxu1 %v4016_v40 }
 0xf99   :  { %3408 = vmatpush3.bf16.msra.mxu1 %v3676_v57 }
 0xf9a   :  { %3409 = vmatprep.subr.bf16.mxu1 %v4016_v40 }
 0xf9d   :  { %3410 = vmatpush3.bf16.msra.mxu1 %v3677_v58 }
0x1040   :  { %v2364_v28 = vpop.f32.mrf.mxu1 }
0x1041   :  { %v2365_v30 = vadd.f32 %v2364_v28, %v2243_v25 }
0x1042   :  { %v2366_v31 = vpop.f32.mrf.mxu1 }
0x1043   :  { %v2367_v33 = vadd.f32 %v2366_v31, %v2247_v26  ;;  %v2371_v35 = vmax.f32 %v2365_v30, 0.0 }
0x1044   :  { %v2368_v36 = vpop.f32.mrf.mxu1 }
0x1045   :  { %v2372_v37 = vmax.f32 %v2367_v33, 0.0  ;;  %v2373_v39 = vpack.c.bf16 %v2371_v35, %v2371_v35 }
0x1046   :  { %v2369_v62 = vpop.f32.mrf.mxu1 }
0x1047   :  { %v2374_v38 = vpack.c.bf16 %v2372_v37, %v2372_v37 }
0x1049   :  { %2544 = vmatprep.mubr.bf16.mxu0 %v2374_v38 }
0x104a   :  { %2545 = vmatmul.mubr.bf16.vlgmr.msra.gmra.mxu0 %v2373_v39 }
0x104b   :  { %3431 = vmatprep.mubr.msk.bf16.mxu0 %vm4017_vm0, %v4016_v40  ;;  %3416 = vmatpush3.bf16.msra.mxu0 %v3678_v59 }
0x104c   :  { %3417 = vmatprep.subr.bf16.mxu0 %v4016_v40 }
0x104f   :  { %3418 = vmatpush3.bf16.msra.mxu0 %v3679_v60 }
0x1050   :  { %3419 = vmatprep.subr.bf16.mxu0 %v4016_v40 }
0x1053   :  { %3420 = vmatpush3.bf16.msra.mxu0 %v3680_v61 }
0x1054   :  { %3421 = vmatprep.subr.bf16.mxu0 %v4016_v40 }
0x1057   :  { %3422 = vmatpush3.bf16.msra.mxu0 %v3681_v63 }
0x1058   :  { %3423 = vmatprep.subr.bf16.mxu0 %v4016_v40 }
0x105b   :  { %3424 = vmatpush3.bf16.msra.mxu0 %v3682_v0 }
0x105c   :  { %3425 = vmatprep.subr.bf16.mxu0 %v4016_v40 }
0x105f   :  { %3426 = vmatpush3.bf16.msra.mxu0 %v3683_v1 }
0x1060   :  { %3427 = vmatprep.subr.bf16.mxu0 %v4016_v40 }
0x1063   :  { %3428 = vmatpush3.bf16.msra.mxu0 %v3684_v12 }
0x1064   :  { %3429 = vmatprep.subr.bf16.mxu0 %v4016_v40 }
0x1067   :  { %3430 = vmatpush3.bf16.msra.mxu0 %v3685_v13 }
0x110a   :  { %v3231_v41 = vpop.f32.mrf.mxu0 }
0x110c   :  { %v3232_v34 = vpop.f32.mrf.mxu0 }
0x110d   :  { %v3233_v42 = vadd.f32 %v3232_v34, %v3231_v41 }
0x110e   :  { %v3234_v43 = vpop.f32.mrf.mxu0 }
0x110f   :  { %v2547_v27 = vadd.f32 %v3233_v42, %v3025_v32 }
0x1110   :  { %v3235_v44 = vpop.f32.mrf.mxu0 }
0x1111   :  { %v2552_v45 = vadd.f32 %v2547_v27, %v2218_v18 }
0x1113   :  { %v2557_v46 = vsel %vm946_vm1, %v2552_v45, 0.0 }
0x1114   :  { %2558 = vadd.xlane.f32.xlu0 %v2557_v46 }
0x119d   :  { %v2559_v48 = vpop.xlane.xlu0 %2558 }
0x119e   :  { %v2560_v49 = vmul.f32 0.0078125, %v2559_v48 }
0x11a0   :  { %v2561_v50 = vsub.f32 %v2552_v45, %v2560_v49 }
0x11a2   :  { %v2562_v51 = vmul.f32 %v2561_v50, %v2561_v50 }
0x11a4   :  { %v2563_v52 = vsel %vm946_vm1, %v2562_v51, 0.0 }
0x11a5   :  { %2564 = vadd.xlane.f32.xlu1 %v2563_v52 }
0x122e   :  { %v2565_v2 = vpop.xlane.xlu1 %2564 }
0x122f   :  { %v2566_v3 = vmul.f32 0.0078125, %v2565_v2 }
0x1231   :  { %v2567_v4 = vadd.f32 1e-05, %v2566_v3 }
0x1233   :  { %3696 = vrsqrt.f32 %v2567_v4 }
0x1240   :  { %v3697_v5 = vpop.eup %3696 }
0x1241   :  { %v2569_v7 = vmul.f32 %v3697_v5, %v2561_v50 }
0x1243   :  { %v2576_v9 = vmul.f32 %v3044_v6, %v2569_v7 }
0x1245   :  { %v2583_v10 = vadd.f32 %v3045_v8, %v2576_v9 }
0x1247   :  { %v2584_v11 = vpack.c.bf16 %v2583_v10, %v2583_v10 }
0x1249   :  { %3412 = vmatmul.mubr.bf16.vlgmr.msra.gmra.mxu1 %v2584_v11 }
0x1309   :  { %v2690_v15 = vpop.f32.mrf.mxu1 }
0x130a   :  { %v2691_v16 = vadd.f32 %v3046_v14, %v2690_v15 }
0x130b   :  { %v3413_v17 = vpop.f32.mrf.mxu1 }
0x130c   :  { %v2696_v18 = vmax.f32 %v2691_v16, 0.0 }
0x130d   :  { %v2693_v19 = vpop.f32.mrf.mxu1 }
0x130e   :  { %v2697_v20 = vpack.c.bf16 %v2696_v18, %v2696_v18 }
0x130f   :  { %v3414_v21 = vpop.f32.mrf.mxu1 }
0x1310   :  { %3432 = vmatmul.mubr.bf16.vlgmr.msra.gmra.mxu0 %v2697_v20 }
0x13d0   :  { %v2803_v23 = vpop.f32.mrf.mxu0 }
0x13d1   :  { %v2804_v40 = vadd.f32 %v3055_v22, %v2803_v23 }
0x13d2   :  { %v3433_v24 = vpop.f32.mrf.mxu0 }
0x13d3   :  { %v2809_v25 = vpack.c.bf16 %v2804_v40, %v2804_v40 }
0x13d4   :  { %v2806_v26 = vpop.f32.mrf.mxu0 }
0x13d5   :  { %2810 = vst [vmem:[#allocation23] sm:$0x3] %v2809_v25 }
0x13d6   :  { %v3434_v28 = vpop.f32.mrf.mxu0 }
0x13d7   :  { %3969 = shalt.err (!%p3966_p13)
}
0x13d8   :  { %2820 = dma.vmem_to_hbm [thread:$0]  %s2818_s28, 32, %s4388_s20, [#allocation4]  }
0x13d9   :  { %3992 = dma.done.wait [#allocation4], 32  }
0x13da   :  { %3993 = vsyncadd [#allocation4], 4294967264 }
0x13db   :  { %2824 = vsyncpa [#allocation3], 1 }
0x13dc   :  { %2825 = vsyncpa [#allocation6], 1 }
0x13dd   :  { %2826 = vsyncpa [#allocation9], 1 }
0x13de   :  { %2827 = vsyncpa [#allocation12], 1 }
0x13df   :  { %2828 = vsyncpa [#allocation15], 1 }
0x13e0   :  { %2829 = vsyncpa [#allocation18], 1 }
0x13e1   :  { %2830 = vsyncpa [#allocation21], 1 }
0x13e2   :  { %2831 = vsyncpa [#allocation4], 1 }

</bundles_post_ra>
